<compile_context>
chip_gen: v7x
topology: tpu7x:2x2x1
jax: 0.10.0
libtpu: 0.0.40
codegen_flags: <defaults>
</compile_context>

<pallas_src>
import functools
import math

import jax
import jax.numpy as jnp
from jax import lax
from jax.experimental import pallas as pl
from jax.experimental.pallas import tpu as pltpu

NUM_GROUPS = 16
GN_EPS = 1e-5


def _tile_rows(v, bt):
    """Repeat a (cb, k) constant bt times along rows -> (bt*cb, k).  Tiny."""
    return v if bt == 1 else jnp.tile(v, (bt, 1))


def _structure_capture_kernel(x_ref, w_ref, a_ref, m_ref, s1_ref, s2_ref,
                              eh_ref, ew_ref, gb_ref, o_ref, *, h, w, bt, cb):
    """One grid step: `bt` samples x `cb` channels, spatial folded to h*w lanes."""
    k = w_ref.shape[-1]
    pad = k // 2
    l = h + w                      # fused [x_h | x_w] gate axis
    hw = h * w
    rows = bt * cb
    dt = x_ref.dtype

    # Segment bookkeeping for the fused [0,h) | [h,h+w) axis (sample-invariant).
    lane = lax.broadcasted_iota(jnp.int32, (rows, l), 1)
    in_h_seg = lane < h
    seg_lo = jnp.where(in_h_seg, 0, h)
    seg_hi = jnp.where(in_h_seg, h, l)

    # ---- bulk pass 1: spatial means for ALL rows in one MXU matmul ---------
    #   (rows, hw) @ (hw, h+w) -> [mean over w | mean over h]
    xv = x_ref[...].reshape(rows, hw)
    means = jnp.dot(xv, m_ref[...], preferred_element_type=jnp.float32)

    # ---- depthwise 'same' conv1d on both segments in one fused pass --------
    # Lane shifts via pltpu.roll (XLU slot) + segment edge masks: no padded
    # copies, and the per-tap weight broadcast is shared by both branches.
    wts = _tile_rows(w_ref[...], bt)                       # (rows, k), tiny
    conv_cat = jnp.zeros((rows, l), jnp.float32)
    for kk in range(k):                                    # static, K = 7
        rolled = pltpu.roll(means, shift=(pad - kk) % l, axis=1)
        src = lane + (kk - pad)
        valid = jnp.logical_and(src >= seg_lo, src < seg_hi)
        conv_cat = conv_cat + wts[:, kk:kk + 1] * jnp.where(valid, rolled, 0.0)

    # ---- GroupNorm(16): per-channel moments via two tiny matmuls -----------
    # stats columns: [mean_h, meansq_h, mean_w, meansq_w] (no lane reduces).
    stats = (jnp.dot(conv_cat, s1_ref[...], preferred_element_type=jnp.float32)
             + jnp.dot(conv_cat * conv_cat, s2_ref[...],
                       preferred_element_type=jnp.float32))           # (rows, 4)

    # Group averaging: per-sample (cb, cb) @ (cb, 4) dots.  This is the only
    # per-sample work left; bt is capped so the loop stays short.
    A = a_ref[...]
    if bt == 1:
        g = jnp.dot(A, stats, preferred_element_type=jnp.float32)
    else:
        g = jnp.concatenate(
            [jnp.dot(A, stats[i * cb:(i + 1) * cb, :],
                     preferred_element_type=jnp.float32)
             for i in range(bt)], axis=0)                              # (rows, 4)

    gm_h, gs_h = g[:, 0:1], g[:, 1:2]
    gm_w, gs_w = g[:, 2:3], g[:, 3:4]
    # Clamp E[x^2]-E[x]^2 at 0: guards fp cancellation for near-constant rows.
    inv_h = lax.rsqrt(jnp.maximum(gs_h - gm_h * gm_h, 0.0) + GN_EPS)
    inv_w = lax.rsqrt(jnp.maximum(gs_w - gm_w * gm_w, 0.0) + GN_EPS)

    # Fold gamma into the normalization: y = conv*scale + shift.
    gb = _tile_rows(gb_ref[...], bt)                       # (rows, 2) = [gamma|beta]
    gamma, beta = gb[:, 0:1], gb[:, 1:2]
    scale_h = inv_h * gamma
    scale_w = inv_w * gamma
    scale = jnp.where(in_h_seg, scale_h, scale_w)
    shift = jnp.where(in_h_seg, beta - gm_h * scale_h, beta - gm_w * scale_w)
    y_cat = jax.nn.sigmoid(conv_cat * scale + shift)       # (rows, h+w)

    # ---- bulk pass 2: expand gates over the folded hw lanes + epilogue -----
    # Tiny 0/1 expansion matmuls (the MXU is idle in this mem-bound op); the
    # final multiply/store is one fused lane-dense pass over the block.
    mult = (jnp.dot(y_cat[:, :h].astype(dt), eh_ref[...],
                    preferred_element_type=jnp.float32)
            * jnp.dot(y_cat[:, h:].astype(dt), ew_ref[...],
                      preferred_element_type=jnp.float32))             # (rows, hw)
    out = x_ref[...].reshape(rows, hw) * mult.astype(dt)
    o_ref[...] = out.astype(o_ref.dtype).reshape(bt, cb, hw)


def _tpu_generation_info():
    """(vmem_capacity_bytes, tensorcores_per_device), conservative fallbacks."""
    vmem_cap = 64 << 20                     # conservative default (v7x-sized)
    try:
        vmem_cap = int(pltpu.get_tpu_info().vmem_capacity_bytes)
    except Exception:
        pass
    cores = 2                               # conservative: assume 2 TCs / megacore
    try:
        kind = jax.devices()[0].device_kind.lower()
        if "lite" in kind or "v5e" in kind or "v6e" in kind:
            cores = 1                       # v5e / v6e: single TensorCore
    except Exception:
        pass
    return vmem_cap, cores


def _plan_tiling(b, c, h, w, itemsize, num_groups=NUM_GROUPS):
    """Pick (batch tile, channel tile, grid, pipeline buffers, vmem limit)."""
    hw = h * w
    cg = c // num_groups
    vmem_cap, cores = _tpu_generation_info()
    big_vmem = vmem_cap >= (100 << 20)      # v5e/v6e class (128 MiB) vs v7x (64 MiB)

    # Block budget = input + output bytes per grid step.
    block_budget = (24 << 20) if big_vmem else (10 << 20)

    lanes = -(-hw // 128) * 128
    per_sample = 2 * (-(-c // 8) * 8) * lanes * itemsize

    bt = min(max(1, block_budget // per_sample),   # VMEM block budget
             max(1, 512 // c),                     # keep per-sample stat loop short
             b)
    if cores > 1 and b >= cores:
        bt = min(bt, max(1, b // cores))           # >= 1 grid step per TensorCore

    # Channel tile: only split channels (at GroupNorm group boundaries) when
    # batch alone cannot give every TensorCore a grid step (e.g. b == 1).
    cb = c
    if cores > 1 and -(-b // bt) < cores:
        step = cg * 8 // math.gcd(cg, 8)           # lcm(cg, 8): group & sublane aligned
        cand = (c // cores) // step * step
        if 0 < cand < c and c % cand == 0:
            cb = cand

    grid = (-(-b // bt), c // cb)
    steps = grid[0] * grid[1]
    buffers = 3 if (big_vmem and steps >= 4) else 2   # 3rd buffer only on 128 MiB parts

    block_bytes = 2 * bt * (-(-cb // 8) * 8) * lanes * itemsize
    vmem_limit = int(min(vmem_cap - (8 << 20),
                         max(32 << 20, (buffers + 1) * block_bytes + (4 << 20))))
    return bt, cb, grid, buffers, vmem_limit


def structure_capture_forward(x, conv_w, gn_gamma, gn_beta, num_groups=NUM_GROUPS):
    """x: (b, c, h, w); conv_w: (c, 1, K) depthwise weights; gn_gamma/beta: (c,)."""
    b, c, h, w = x.shape
    k = conv_w.shape[-1]
    assert c % num_groups == 0, "GroupNorm(16, c) requires c % 16 == 0"
    cg = c // num_groups
    hw = h * w
    l = h + w
    dt = x.dtype
    itemsize = jnp.dtype(dt).itemsize

    bt, cb, grid, buffers, vmem_limit = _plan_tiling(b, c, h, w, itemsize, num_groups)

    # ---- small host-built constant operands --------------------------------
    f32 = jnp.float32
    row = jnp.arange(hw) // w
    col = jnp.arange(hw) % w
    Eh = (row[None, :] == jnp.arange(h)[:, None]).astype(f32)          # (h, hw)
    Ew = (col[None, :] == jnp.arange(w)[:, None]).astype(f32)          # (w, hw)
    # Spatial-mean matrix: (rows, hw) @ M -> [mean over w | mean over h].
    M = jnp.concatenate([Eh.T / float(w), Ew.T / float(h)], axis=1)    # (hw, h+w)

    # Per-channel GN moment matrices: stats = conv@S1 + conv^2@S2.
    seg = jnp.arange(l)
    in_h = (seg < h).astype(f32)
    in_w = 1.0 - in_h
    z = jnp.zeros((l,), f32)
    S1 = jnp.stack([in_h / float(h), z, in_w / float(w), z], axis=1)   # (l, 4)
    S2 = jnp.stack([z, in_h / float(h), z, in_w / float(w)], axis=1)   # (l, 4)

    # Group-average matrix for one channel block (groups never cross blocks).
    gidx = jnp.arange(cb) // cg
    A = (gidx[:, None] == gidx[None, :]).astype(f32) / float(cg)       # (cb, cb)

    dw_w = conv_w.reshape(c, k).astype(f32)                            # (c, k)
    gb = jnp.stack([gn_gamma, gn_beta], axis=1).astype(f32)            # (c, 2)

    # Lane-dense layout: fold (h, w) -> h*w (free reshape of contiguous NCHW).
    x3 = x.reshape(b, c, hw)
    M_dt, Eh_dt, Ew_dt = M.astype(dt), Eh.astype(dt), Ew.astype(dt)

    kernel = functools.partial(_structure_capture_kernel, h=h, w=w, bt=bt, cb=cb)

    buf_kwargs = {}
    if buffers > 2:
        buf_kwargs["pipeline_mode"] = pl.Buffered(buffers)
    x_spec = pl.BlockSpec((bt, cb, hw), lambda i, j: (i, j, 0), **buf_kwargs)
    out_spec = pl.BlockSpec((bt, cb, hw), lambda i, j: (i, j, 0), **buf_kwargs)

    # Advisory cost hint: memory-bound op, ~2 HBM passes over x.
    flops = int(b * c * (2 * hw * l + 2 * l * k + 16 * l + 8 * cb
                         + 2 * (h + w) * hw + hw))
    cost = pl.CostEstimate(flops=flops,
                           transcendentals=int(b * c * l),
                           bytes_accessed=int(2 * b * c * hw * itemsize))

    out3 = pl.pallas_call(
        kernel,
        out_shape=jax.ShapeDtypeStruct((b, c, hw), dt),
        grid_spec=pltpu.PrefetchScalarGridSpec(
            num_scalar_prefetch=0,
            grid=grid,
            in_specs=[
                x_spec,                                               # x (folded)
                pl.BlockSpec((cb, k), lambda i, j: (j, 0)),           # dw conv weights
                pl.BlockSpec((cb, cb), lambda i, j: (0, 0)),          # group-average A
                pl.BlockSpec((hw, l), lambda i, j: (0, 0)),           # mean matrix M
                pl.BlockSpec((l, 4), lambda i, j: (0, 0)),            # stat matrix S1
                pl.BlockSpec((l, 4), lambda i, j: (0, 0)),            # stat matrix S2
                pl.BlockSpec((h, hw), lambda i, j: (0, 0)),           # expand Eh
                pl.BlockSpec((w, hw), lambda i, j: (0, 0)),           # expand Ew
                pl.BlockSpec((cb, 2), lambda i, j: (j, 0)),           # [gamma|beta]
            ],
            out_specs=out_spec,
        ),
        compiler_params=pltpu.CompilerParams(
            dimension_semantics=("parallel", "parallel"),
            vmem_limit_bytes=vmem_limit,
        ),
        cost_estimate=cost,
    )(x3, dw_w, A, M_dt, S1, S2, Eh_dt, Ew_dt, gb)

    return out3.reshape(b, c, h, w)


def _reference_forward(x, conv_w, gn_gamma, gn_beta, num_groups=NUM_GROUPS):
    """Pure-JAX reference mirroring the PyTorch module."""
    b, c, h, w = x.shape
    k = conv_w.shape[-1]
    pad = k // 2
    cg = c // num_groups

    def branch(v):  # (b, c, L)
        L = v.shape[-1]
        vp = jnp.pad(v, ((0, 0), (0, 0), (pad, pad)))
        out = jnp.zeros_like(v)
        for kk in range(k):
            out = out + conv_w[:, 0, kk][None, :, None] * vp[:, :, kk:kk + L]
        og = out.reshape(b, num_groups, cg, L)
        mean = og.mean(axis=(2, 3), keepdims=True)
        var = ((og - mean) ** 2).mean(axis=(2, 3), keepdims=True)
        normed = ((og - mean) / jnp.sqrt(var + GN_EPS)).reshape(b, c, L)
        return jax.nn.sigmoid(normed * gn_gamma[None, :, None] + gn_beta[None, :, None])

    y_h = branch(x.mean(axis=3))[:, :, :, None]
    y_w = branch(x.mean(axis=2))[:, :, None, :]
    return x * y_h * y_w


if __name__ == "__main__":
    # channel must be divisible by 16 (GroupNorm(16, channel))
    b, c, h, w = 2, 32, 16, 16
    kernel_size = 7

    key = jax.random.PRNGKey(0)
    kx, kw, kg, kb = jax.random.split(key, 4)

    x = jax.random.normal(kx, (b, c, h, w), dtype=jnp.float32)
    conv_w = 0.1 * jax.random.normal(kw, (c, 1, kernel_size), dtype=jnp.float32)
    gn_gamma = 1.0 + 0.1 * jax.random.normal(kg, (c,), dtype=jnp.float32)
    gn_beta = 0.1 * jax.random.normal(kb, (c,), dtype=jnp.float32)

    out = structure_capture_forward(x, conv_w, gn_gamma, gn_beta)
    out = jax.block_until_ready(out)

    ref = _reference_forward(x, conv_w, gn_gamma, gn_beta)
    assert out.shape == (b, c, h, w)
    # Tolerance leaves headroom for the MXU's multi-pass f32 rounding in the
    # tiny helper matmuls (mean / GN-stat / expansion).
    assert jnp.allclose(out, ref, rtol=2e-3, atol=5e-5), "mismatch vs JAX reference"

    print("KERNEL_OK")
</pallas_src>

<mosaic_0001>
module attributes {stable_mosaic.version = 11 : i64} {
  func.func @_structure_capture_kernel(%arg0: i32, %arg1: i32, %arg2: memref<1x32x256xf32, #tpu.memory_space<vmem>>, %arg3: memref<32x7xf32, #tpu.memory_space<vmem>>, %arg4: memref<32x32xf32, #tpu.memory_space<vmem>>, %arg5: memref<256x32xf32, #tpu.memory_space<vmem>>, %arg6: memref<32x4xf32, #tpu.memory_space<vmem>>, %arg7: memref<32x4xf32, #tpu.memory_space<vmem>>, %arg8: memref<16x256xf32, #tpu.memory_space<vmem>>, %arg9: memref<16x256xf32, #tpu.memory_space<vmem>>, %arg10: memref<32x2xf32, #tpu.memory_space<vmem>>, %arg11: memref<1x32x256xf32, #tpu.memory_space<vmem>>) attributes {dimension_semantics = [#tpu.dimension_semantics<parallel>, #tpu.dimension_semantics<parallel>], iteration_bounds = array<i64: 2, 1>, scalar_prefetch = 0 : i64, scratch_operands = 0 : i64, tpu.core_type = #tpu.core_type<tc>, window_params = [{transform_indices = @transform_0, window_bounds = array<i64: 1, 32, 256>}, {transform_indices = @transform_1, window_bounds = array<i64: 32, 7>}, {pipeline_mode = #tpu.pipeline_mode<synchronous>, transform_indices = @transform_2, window_bounds = array<i64: 32, 32>}, {pipeline_mode = #tpu.pipeline_mode<synchronous>, transform_indices = @transform_3, window_bounds = array<i64: 256, 32>}, {pipeline_mode = #tpu.pipeline_mode<synchronous>, transform_indices = @transform_4, window_bounds = array<i64: 32, 4>}, {pipeline_mode = #tpu.pipeline_mode<synchronous>, transform_indices = @transform_5, window_bounds = array<i64: 32, 4>}, {pipeline_mode = #tpu.pipeline_mode<synchronous>, transform_indices = @transform_6, window_bounds = array<i64: 16, 256>}, {pipeline_mode = #tpu.pipeline_mode<synchronous>, transform_indices = @transform_7, window_bounds = array<i64: 16, 256>}, {transform_indices = @transform_8, window_bounds = array<i64: 32, 2>}, {transform_indices = @transform_9, window_bounds = array<i64: 1, 32, 256>}]} {
    %0 = tpu.iota {dimensions = array<i32: 1>} : vector<32x32xi32>
    %c16_i32 = arith.constant 16 : i32
    %1 = vector.broadcast %c16_i32 : i32 to vector<32x32xi32>
    %2 = arith.cmpi slt, %0, %1 : vector<32x32xi32>
    %c0_i32 = arith.constant 0 : i32
    %c16_i32_0 = arith.constant 16 : i32
    %3 = vector.broadcast %c0_i32 : i32 to vector<32x32xi32>
    %4 = vector.broadcast %c16_i32_0 : i32 to vector<32x32xi32>
    %5 = arith.select %2, %3, %4 : vector<32x32xi1>, vector<32x32xi32>
    %c16_i32_1 = arith.constant 16 : i32
    %c32_i32 = arith.constant 32 : i32
    %6 = vector.broadcast %c16_i32_1 : i32 to vector<32x32xi32>
    %7 = vector.broadcast %c32_i32 : i32 to vector<32x32xi32>
    %8 = arith.select %2, %6, %7 : vector<32x32xi1>, vector<32x32xi32>
    %c0 = arith.constant 0 : index
    %c0_2 = arith.constant 0 : index
    %c0_3 = arith.constant 0 : index
    %9 = vector.load %arg2[%c0, %c0_2, %c0_3] : memref<1x32x256xf32, #tpu.memory_space<vmem>>, vector<1x32x256xf32>
    %10 = vector.shape_cast %9 : vector<1x32x256xf32> to vector<32x256xf32>
    %c0_4 = arith.constant 0 : index
    %c0_5 = arith.constant 0 : index
    %11 = vector.load %arg5[%c0_4, %c0_5] : memref<256x32xf32, #tpu.memory_space<vmem>>, vector<256x32xf32>
    %cst = arith.constant dense<0.000000e+00> : vector<32x32xf32>
    %12 = tpu.matmul %10, %11, %cst {dimension_numbers = #tpu.dot_dimension_numbers<[1], [0], [0], [1], [0, 0, 1, 1], [], []>} : vector<32x256xf32>, vector<256x32xf32>, vector<32x32xf32> -> vector<32x32xf32>
    %c0_6 = arith.constant 0 : index
    %c0_7 = arith.constant 0 : index
    %13 = vector.load %arg3[%c0_6, %c0_7] : memref<32x7xf32, #tpu.memory_space<vmem>>, vector<32x7xf32>
    %cst_8 = arith.constant 0.000000e+00 : f32
    %14 = vector.broadcast %cst_8 : f32 to vector<32x32xf32>
    %c3_i32 = arith.constant 3 : i32
    %15 = tpu.dynamic_rotate %12 by %c3_i32 dim 1 : vector<32x32xf32>, i32 -> vector<32x32xf32>
    %c-3_i32 = arith.constant -3 : i32
    %16 = vector.broadcast %c-3_i32 : i32 to vector<32x32xi32>
    %17 = arith.addi %0, %16 : vector<32x32xi32>
    %18 = arith.cmpi sge, %17, %5 : vector<32x32xi32>
    %19 = arith.cmpi slt, %17, %8 : vector<32x32xi32>
    %20 = arith.andi %18, %19 : vector<32x32xi1>
    %21 = vector.extract_strided_slice %13 {offsets = [0, 0], sizes = [32, 1], strides = [1, 1]} : vector<32x7xf32> to vector<32x1xf32>
    %cst_9 = arith.constant 0.000000e+00 : f32
    %22 = vector.broadcast %cst_9 : f32 to vector<32x32xf32>
    %23 = arith.select %20, %15, %22 : vector<32x32xi1>, vector<32x32xf32>
    %24 = vector.broadcast %21 : vector<32x1xf32> to vector<32x32xf32>
    %25 = arith.mulf %24, %23 : vector<32x32xf32>
    %26 = arith.addf %14, %25 : vector<32x32xf32>
    %c2_i32 = arith.constant 2 : i32
    %27 = tpu.dynamic_rotate %12 by %c2_i32 dim 1 : vector<32x32xf32>, i32 -> vector<32x32xf32>
    %c-2_i32 = arith.constant -2 : i32
    %28 = vector.broadcast %c-2_i32 : i32 to vector<32x32xi32>
    %29 = arith.addi %0, %28 : vector<32x32xi32>
    %30 = arith.cmpi sge, %29, %5 : vector<32x32xi32>
    %31 = arith.cmpi slt, %29, %8 : vector<32x32xi32>
    %32 = arith.andi %30, %31 : vector<32x32xi1>
    %33 = vector.extract_strided_slice %13 {offsets = [0, 1], sizes = [32, 1], strides = [1, 1]} : vector<32x7xf32> to vector<32x1xf32>
    %cst_10 = arith.constant 0.000000e+00 : f32
    %34 = vector.broadcast %cst_10 : f32 to vector<32x32xf32>
    %35 = arith.select %32, %27, %34 : vector<32x32xi1>, vector<32x32xf32>
    %36 = vector.broadcast %33 : vector<32x1xf32> to vector<32x32xf32>
    %37 = arith.mulf %36, %35 : vector<32x32xf32>
    %38 = arith.addf %26, %37 : vector<32x32xf32>
    %c1_i32 = arith.constant 1 : i32
    %39 = tpu.dynamic_rotate %12 by %c1_i32 dim 1 : vector<32x32xf32>, i32 -> vector<32x32xf32>
    %c-1_i32 = arith.constant -1 : i32
    %40 = vector.broadcast %c-1_i32 : i32 to vector<32x32xi32>
    %41 = arith.addi %0, %40 : vector<32x32xi32>
    %42 = arith.cmpi sge, %41, %5 : vector<32x32xi32>
    %43 = arith.cmpi slt, %41, %8 : vector<32x32xi32>
    %44 = arith.andi %42, %43 : vector<32x32xi1>
    %45 = vector.extract_strided_slice %13 {offsets = [0, 2], sizes = [32, 1], strides = [1, 1]} : vector<32x7xf32> to vector<32x1xf32>
    %cst_11 = arith.constant 0.000000e+00 : f32
    %46 = vector.broadcast %cst_11 : f32 to vector<32x32xf32>
    %47 = arith.select %44, %39, %46 : vector<32x32xi1>, vector<32x32xf32>
    %48 = vector.broadcast %45 : vector<32x1xf32> to vector<32x32xf32>
    %49 = arith.mulf %48, %47 : vector<32x32xf32>
    %50 = arith.addf %38, %49 : vector<32x32xf32>
    %c0_i32_12 = arith.constant 0 : i32
    %51 = tpu.dynamic_rotate %12 by %c0_i32_12 dim 1 : vector<32x32xf32>, i32 -> vector<32x32xf32>
    %c0_i32_13 = arith.constant 0 : i32
    %52 = vector.broadcast %c0_i32_13 : i32 to vector<32x32xi32>
    %53 = arith.addi %0, %52 : vector<32x32xi32>
    %54 = arith.cmpi sge, %53, %5 : vector<32x32xi32>
    %55 = arith.cmpi slt, %53, %8 : vector<32x32xi32>
    %56 = arith.andi %54, %55 : vector<32x32xi1>
    %57 = vector.extract_strided_slice %13 {offsets = [0, 3], sizes = [32, 1], strides = [1, 1]} : vector<32x7xf32> to vector<32x1xf32>
    %cst_14 = arith.constant 0.000000e+00 : f32
    %58 = vector.broadcast %cst_14 : f32 to vector<32x32xf32>
    %59 = arith.select %56, %51, %58 : vector<32x32xi1>, vector<32x32xf32>
    %60 = vector.broadcast %57 : vector<32x1xf32> to vector<32x32xf32>
    %61 = arith.mulf %60, %59 : vector<32x32xf32>
    %62 = arith.addf %50, %61 : vector<32x32xf32>
    %c31_i32 = arith.constant 31 : i32
    %63 = tpu.dynamic_rotate %12 by %c31_i32 dim 1 : vector<32x32xf32>, i32 -> vector<32x32xf32>
    %c1_i32_15 = arith.constant 1 : i32
    %64 = vector.broadcast %c1_i32_15 : i32 to vector<32x32xi32>
    %65 = arith.addi %0, %64 : vector<32x32xi32>
    %66 = arith.cmpi sge, %65, %5 : vector<32x32xi32>
    %67 = arith.cmpi slt, %65, %8 : vector<32x32xi32>
    %68 = arith.andi %66, %67 : vector<32x32xi1>
    %69 = vector.extract_strided_slice %13 {offsets = [0, 4], sizes = [32, 1], strides = [1, 1]} : vector<32x7xf32> to vector<32x1xf32>
    %cst_16 = arith.constant 0.000000e+00 : f32
    %70 = vector.broadcast %cst_16 : f32 to vector<32x32xf32>
    %71 = arith.select %68, %63, %70 : vector<32x32xi1>, vector<32x32xf32>
    %72 = vector.broadcast %69 : vector<32x1xf32> to vector<32x32xf32>
    %73 = arith.mulf %72, %71 : vector<32x32xf32>
    %74 = arith.addf %62, %73 : vector<32x32xf32>
    %c30_i32 = arith.constant 30 : i32
    %75 = tpu.dynamic_rotate %12 by %c30_i32 dim 1 : vector<32x32xf32>, i32 -> vector<32x32xf32>
    %c2_i32_17 = arith.constant 2 : i32
    %76 = vector.broadcast %c2_i32_17 : i32 to vector<32x32xi32>
    %77 = arith.addi %0, %76 : vector<32x32xi32>
    %78 = arith.cmpi sge, %77, %5 : vector<32x32xi32>
    %79 = arith.cmpi slt, %77, %8 : vector<32x32xi32>
    %80 = arith.andi %78, %79 : vector<32x32xi1>
    %81 = vector.extract_strided_slice %13 {offsets = [0, 5], sizes = [32, 1], strides = [1, 1]} : vector<32x7xf32> to vector<32x1xf32>
    %cst_18 = arith.constant 0.000000e+00 : f32
    %82 = vector.broadcast %cst_18 : f32 to vector<32x32xf32>
    %83 = arith.select %80, %75, %82 : vector<32x32xi1>, vector<32x32xf32>
    %84 = vector.broadcast %81 : vector<32x1xf32> to vector<32x32xf32>
    %85 = arith.mulf %84, %83 : vector<32x32xf32>
    %86 = arith.addf %74, %85 : vector<32x32xf32>
    %c29_i32 = arith.constant 29 : i32
    %87 = tpu.dynamic_rotate %12 by %c29_i32 dim 1 : vector<32x32xf32>, i32 -> vector<32x32xf32>
    %c3_i32_19 = arith.constant 3 : i32
    %88 = vector.broadcast %c3_i32_19 : i32 to vector<32x32xi32>
    %89 = arith.addi %0, %88 : vector<32x32xi32>
    %90 = arith.cmpi sge, %89, %5 : vector<32x32xi32>
    %91 = arith.cmpi slt, %89, %8 : vector<32x32xi32>
    %92 = arith.andi %90, %91 : vector<32x32xi1>
    %93 = vector.extract_strided_slice %13 {offsets = [0, 6], sizes = [32, 1], strides = [1, 1]} : vector<32x7xf32> to vector<32x1xf32>
    %cst_20 = arith.constant 0.000000e+00 : f32
    %94 = vector.broadcast %cst_20 : f32 to vector<32x32xf32>
    %95 = arith.select %92, %87, %94 : vector<32x32xi1>, vector<32x32xf32>
    %96 = vector.broadcast %93 : vector<32x1xf32> to vector<32x32xf32>
    %97 = arith.mulf %96, %95 : vector<32x32xf32>
    %98 = arith.addf %86, %97 : vector<32x32xf32>
    %c0_21 = arith.constant 0 : index
    %c0_22 = arith.constant 0 : index
    %99 = vector.load %arg6[%c0_21, %c0_22] : memref<32x4xf32, #tpu.memory_space<vmem>>, vector<32x4xf32>
    %cst_23 = arith.constant dense<0.000000e+00> : vector<32x4xf32>
    %100 = tpu.matmul %98, %99, %cst_23 {dimension_numbers = #tpu.dot_dimension_numbers<[1], [0], [0], [1], [0, 0, 1, 1], [], []>} : vector<32x32xf32>, vector<32x4xf32>, vector<32x4xf32> -> vector<32x4xf32>
    %101 = arith.mulf %98, %98 : vector<32x32xf32>
    %c0_24 = arith.constant 0 : index
    %c0_25 = arith.constant 0 : index
    %102 = vector.load %arg7[%c0_24, %c0_25] : memref<32x4xf32, #tpu.memory_space<vmem>>, vector<32x4xf32>
    %cst_26 = arith.constant dense<0.000000e+00> : vector<32x4xf32>
    %103 = tpu.matmul %101, %102, %cst_26 {dimension_numbers = #tpu.dot_dimension_numbers<[1], [0], [0], [1], [0, 0, 1, 1], [], []>} : vector<32x32xf32>, vector<32x4xf32>, vector<32x4xf32> -> vector<32x4xf32>
    %104 = arith.addf %100, %103 : vector<32x4xf32>
    %c0_27 = arith.constant 0 : index
    %c0_28 = arith.constant 0 : index
    %105 = vector.load %arg4[%c0_27, %c0_28] : memref<32x32xf32, #tpu.memory_space<vmem>>, vector<32x32xf32>
    %cst_29 = arith.constant dense<0.000000e+00> : vector<32x4xf32>
    %106 = tpu.matmul %105, %104, %cst_29 {dimension_numbers = #tpu.dot_dimension_numbers<[1], [0], [0], [1], [0, 0, 1, 1], [], []>} : vector<32x32xf32>, vector<32x4xf32>, vector<32x4xf32> -> vector<32x4xf32>
    %107 = vector.extract_strided_slice %106 {offsets = [0, 0], sizes = [32, 1], strides = [1, 1]} : vector<32x4xf32> to vector<32x1xf32>
    %108 = vector.extract_strided_slice %106 {offsets = [0, 1], sizes = [32, 1], strides = [1, 1]} : vector<32x4xf32> to vector<32x1xf32>
    %109 = vector.extract_strided_slice %106 {offsets = [0, 2], sizes = [32, 1], strides = [1, 1]} : vector<32x4xf32> to vector<32x1xf32>
    %110 = vector.extract_strided_slice %106 {offsets = [0, 3], sizes = [32, 1], strides = [1, 1]} : vector<32x4xf32> to vector<32x1xf32>
    %111 = arith.mulf %107, %107 : vector<32x1xf32>
    %112 = arith.subf %108, %111 : vector<32x1xf32>
    %cst_30 = arith.constant 0.000000e+00 : f32
    %113 = vector.broadcast %cst_30 : f32 to vector<32x1xf32>
    %114 = arith.maximumf %112, %113 : vector<32x1xf32>
    %cst_31 = arith.constant 9.99999974E-6 : f32
    %115 = vector.broadcast %cst_31 : f32 to vector<32x1xf32>
    %116 = arith.addf %114, %115 : vector<32x1xf32>
    %117 = math.rsqrt %116 : vector<32x1xf32>
    %118 = arith.mulf %109, %109 : vector<32x1xf32>
    %119 = arith.subf %110, %118 : vector<32x1xf32>
    %cst_32 = arith.constant 0.000000e+00 : f32
    %120 = vector.broadcast %cst_32 : f32 to vector<32x1xf32>
    %121 = arith.maximumf %119, %120 : vector<32x1xf32>
    %cst_33 = arith.constant 9.99999974E-6 : f32
    %122 = vector.broadcast %cst_33 : f32 to vector<32x1xf32>
    %123 = arith.addf %121, %122 : vector<32x1xf32>
    %124 = math.rsqrt %123 : vector<32x1xf32>
    %c0_34 = arith.constant 0 : index
    %c0_35 = arith.constant 0 : index
    %125 = vector.load %arg10[%c0_34, %c0_35] : memref<32x2xf32, #tpu.memory_space<vmem>>, vector<32x2xf32>
    %126 = vector.extract_strided_slice %125 {offsets = [0, 0], sizes = [32, 1], strides = [1, 1]} : vector<32x2xf32> to vector<32x1xf32>
    %127 = vector.extract_strided_slice %125 {offsets = [0, 1], sizes = [32, 1], strides = [1, 1]} : vector<32x2xf32> to vector<32x1xf32>
    %128 = arith.mulf %117, %126 : vector<32x1xf32>
    %129 = arith.mulf %124, %126 : vector<32x1xf32>
    %130 = vector.shape_cast %128 : vector<32x1xf32> to vector<32x1xf32>
    %131 = vector.broadcast %130 : vector<32x1xf32> to vector<32x32xf32>
    %132 = vector.shape_cast %129 : vector<32x1xf32> to vector<32x1xf32>
    %133 = vector.broadcast %132 : vector<32x1xf32> to vector<32x32xf32>
    %134 = arith.select %2, %131, %133 : vector<32x32xi1>, vector<32x32xf32>
    %135 = arith.mulf %107, %128 : vector<32x1xf32>
    %136 = arith.subf %127, %135 : vector<32x1xf32>
    %137 = arith.mulf %109, %129 : vector<32x1xf32>
    %138 = arith.subf %127, %137 : vector<32x1xf32>
    %139 = vector.shape_cast %136 : vector<32x1xf32> to vector<32x1xf32>
    %140 = vector.broadcast %139 : vector<32x1xf32> to vector<32x32xf32>
    %141 = vector.shape_cast %138 : vector<32x1xf32> to vector<32x1xf32>
    %142 = vector.broadcast %141 : vector<32x1xf32> to vector<32x32xf32>
    %143 = arith.select %2, %140, %142 : vector<32x32xi1>, vector<32x32xf32>
    %144 = arith.mulf %98, %134 : vector<32x32xf32>
    %145 = arith.addf %144, %143 : vector<32x32xf32>
    %146 = arith.negf %145 : vector<32x32xf32>
    %147 = math.exp %146 : vector<32x32xf32>
    %cst_36 = arith.constant 1.000000e+00 : f32
    %148 = vector.broadcast %cst_36 : f32 to vector<32x32xf32>
    %149 = arith.addf %148, %147 : vector<32x32xf32>
    %150 = arith.divf %148, %149 : vector<32x32xf32>
    %151 = vector.extract_strided_slice %150 {offsets = [0, 0], sizes = [32, 16], strides = [1, 1]} : vector<32x32xf32> to vector<32x16xf32>
    %c0_37 = arith.constant 0 : index
    %c0_38 = arith.constant 0 : index
    %152 = vector.load %arg8[%c0_37, %c0_38] : memref<16x256xf32, #tpu.memory_space<vmem>>, vector<16x256xf32>
    %cst_39 = arith.constant dense<0.000000e+00> : vector<32x256xf32>
    %153 = tpu.matmul %151, %152, %cst_39 {dimension_numbers = #tpu.dot_dimension_numbers<[1], [0], [0], [1], [0, 0, 1, 1], [], []>} : vector<32x16xf32>, vector<16x256xf32>, vector<32x256xf32> -> vector<32x256xf32>
    %154 = vector.extract_strided_slice %150 {offsets = [0, 16], sizes = [32, 16], strides = [1, 1]} : vector<32x32xf32> to vector<32x16xf32>
    %c0_40 = arith.constant 0 : index
    %c0_41 = arith.constant 0 : index
    %155 = vector.load %arg9[%c0_40, %c0_41] : memref<16x256xf32, #tpu.memory_space<vmem>>, vector<16x256xf32>
    %cst_42 = arith.constant dense<0.000000e+00> : vector<32x256xf32>
    %156 = tpu.matmul %154, %155, %cst_42 {dimension_numbers = #tpu.dot_dimension_numbers<[1], [0], [0], [1], [0, 0, 1, 1], [], []>} : vector<32x16xf32>, vector<16x256xf32>, vector<32x256xf32> -> vector<32x256xf32>
    %157 = arith.mulf %153, %156 : vector<32x256xf32>
    %c0_43 = arith.constant 0 : index
    %c0_44 = arith.constant 0 : index
    %c0_45 = arith.constant 0 : index
    %158 = vector.load %arg2[%c0_43, %c0_44, %c0_45] : memref<1x32x256xf32, #tpu.memory_space<vmem>>, vector<1x32x256xf32>
    %159 = vector.shape_cast %158 : vector<1x32x256xf32> to vector<32x256xf32>
    %160 = arith.mulf %159, %157 : vector<32x256xf32>
    %161 = vector.shape_cast %160 : vector<32x256xf32> to vector<1x32x256xf32>
    %c0_46 = arith.constant 0 : index
    %c0_47 = arith.constant 0 : index
    %c0_48 = arith.constant 0 : index
    %162 = vector.load %arg11[%c0_46, %c0_47, %c0_48] : memref<1x32x256xf32, #tpu.memory_space<vmem>>, vector<1x32x256xf32>
    tpu.vector_store %arg11[%c0_46, %c0_47, %c0_48], %161 {strides = array<i32>} : memref<1x32x256xf32, #tpu.memory_space<vmem>>, vector<1x32x256xf32>,
    return
  }
  func.func @transform_0(%arg0: i32, %arg1: i32) -> (i32, i32, i32) {
    %c0_i32 = arith.constant 0 : i32
    %c0_i32_0 = arith.constant 0 : i32
    return %arg0, %arg1, %c0_i32 : i32, i32, i32
  }
  func.func @transform_1(%arg0: i32, %arg1: i32) -> (i32, i32) {
    %c0_i32 = arith.constant 0 : i32
    %c0_i32_0 = arith.constant 0 : i32
    return %arg1, %c0_i32 : i32, i32
  }
  func.func @transform_2(%arg0: i32, %arg1: i32) -> (i32, i32) {
    %c0_i32 = arith.constant 0 : i32
    %c0_i32_0 = arith.constant 0 : i32
    %c0_i32_1 = arith.constant 0 : i32
    return %c0_i32, %c0_i32_0 : i32, i32
  }
  func.func @transform_3(%arg0: i32, %arg1: i32) -> (i32, i32) {
    %c0_i32 = arith.constant 0 : i32
    %c0_i32_0 = arith.constant 0 : i32
    %c0_i32_1 = arith.constant 0 : i32
    return %c0_i32, %c0_i32_0 : i32, i32
  }
  func.func @transform_4(%arg0: i32, %arg1: i32) -> (i32, i32) {
    %c0_i32 = arith.constant 0 : i32
    %c0_i32_0 = arith.constant 0 : i32
    %c0_i32_1 = arith.constant 0 : i32
    return %c0_i32, %c0_i32_0 : i32, i32
  }
  func.func @transform_5(%arg0: i32, %arg1: i32) -> (i32, i32) {
    %c0_i32 = arith.constant 0 : i32
    %c0_i32_0 = arith.constant 0 : i32
    %c0_i32_1 = arith.constant 0 : i32
    return %c0_i32, %c0_i32_0 : i32, i32
  }
  func.func @transform_6(%arg0: i32, %arg1: i32) -> (i32, i32) {
    %c0_i32 = arith.constant 0 : i32
    %c0_i32_0 = arith.constant 0 : i32
    %c0_i32_1 = arith.constant 0 : i32
    return %c0_i32, %c0_i32_0 : i32, i32
  }
  func.func @transform_7(%arg0: i32, %arg1: i32) -> (i32, i32) {
    %c0_i32 = arith.constant 0 : i32
    %c0_i32_0 = arith.constant 0 : i32
    %c0_i32_1 = arith.constant 0 : i32
    return %c0_i32, %c0_i32_0 : i32, i32
  }
  func.func @transform_8(%arg0: i32, %arg1: i32) -> (i32, i32) {
    %c0_i32 = arith.constant 0 : i32
    %c0_i32_0 = arith.constant 0 : i32
    return %arg1, %c0_i32 : i32, i32
  }
  func.func @transform_9(%arg0: i32, %arg1: i32) -> (i32, i32, i32) {
    %c0_i32 = arith.constant 0 : i32
    %c0_i32_0 = arith.constant 0 : i32
    return %arg0, %arg1, %c0_i32 : i32, i32, i32
  }
}

</mosaic_0001>

<bundles_post_ra>
// kernel: tpu_custom_call.1
= control target key start
LH: loop header
LB: loop body
LE: loop exit
PB: predicated region body
PF: predicated region fallthrough
CT: control target
= control target key end

     0   :  { %14 = vsyncpa [#allocation3], 0  ;;  %s3099_s0 = inlined_call_operand.vmem [shape: f32[2,32,256], index: 0, kind: input, shape index: {}]   ;;  %s3100_s1 = inlined_call_operand.vmem [shape: f32[32,7], index: 1, kind: input, shape index: {}]   ;;  %s3101_s2 = inlined_call_operand.vmem [shape: f32[32,32], index: 2, kind: input, shape index: {}]   ;;  %s3102_s3 = inlined_call_operand.vmem [shape: f32[256,32], index: 3, kind: input, shape index: {}]   ;;  %s3103_s4 = inlined_call_operand.vmem [shape: f32[32,4], index: 4, kind: input, shape index: {}]   ;;  %s3104_s5 = inlined_call_operand.vmem [shape: f32[32,4], index: 5, kind: input, shape index: {}]   ;;  %s3105_s6 = inlined_call_operand.vmem [shape: f32[16,256], index: 6, kind: input, shape index: {}]   ;;  %s3106_s7 = inlined_call_operand.vmem [shape: f32[16,256], index: 7, kind: input, shape index: {}]   ;;  %s3107_s8 = inlined_call_operand.vmem [shape: f32[32,2], index: 8, kind: input, shape index: {}]   ;;  %s3108_s9 = inlined_call_operand.hbm [shape: f32[2,32,256], index: 9, kind: output, shape index: {}]  }
   0x1   :  { %16 = vsyncpa [#allocation3 + $0x1], 0  ;;  %s2335_s30 = smov 0   ;;  %s2337_s10 = smov 0  }
   0x2   :  { %s2339_s11 = smov 0   ;;  %s2341_s12 = smov 0  }
   0x3   :  { %s2343_s13 = smov 0   ;;  %s2345_s14 = smov 0  }
   0x4 LB: > { %s1827_s15 = sadd.s32 4294967295, %s2259_s14   ;;  %s1828_s16 = sadd.s32 4294967294, %s2259_s14   ;;  %s2259_s14 = sphi %s2345_s14, %s22_s14   ;;  %s2255_s13 = sphi %s2343_s13, %s3133_s13   ;;  %s2251_s12 = sphi %s2341_s12, %s3132_s12   ;;  %s2247_s11 = sphi %s2339_s11, %s3131_s11   ;;  %s2243_s10 = sphi %s2337_s10, %s3130_s10   ;;  %s2239_s30 = sphi %s2335_s30, %s3129_s30  }
   0x5   : > { %s34_s17 = sadd.s32 1, %s2255_s13  ;;  %s249_s18 = sadd.s32 1, %s2247_s11 }
   0x6   : > { %p36_p0 = scmp.ge.s32.totalorder %s34_s17, 2  ;;  %p259_p1 = scmp.ne.s32.totalorder %s2247_s11, %s2243_s10 }
   0x7   : > { %p260_p2 = scmp.eq.s32.totalorder %s1827_s15, 1  ;;  %p265_p3 = scmp.ne.s32.totalorder %s2243_s10, %s2239_s30 }
   0x8   : > { %s3135_s17 = smov (%p36_p0, %s34_s17), 0  ;;  %p266_p5 = scmp.eq.s32.totalorder %s1828_s16, 1 }
   0x9   : > { %3116 = sst [smem:[#allocation5_spill]] %s3135_s17  ;;  %p2375_p4 = por %p260_p2, %p259_p1 }
   0xa   : > { %s244_s20 = ssub.s32 %s2255_s13, %s3135_s17  ;;  %p1833_p6 = scmp.ge.s32.totalorder %s2259_s14, 1 }
   0xb   : > { %p247_p7 = scmp.eq.s32.totalorder %s244_s20, 0  ;;  %p2382_p8 = por %p266_p5, %p265_p3 }
   0xc   : > { %p334_p9 = scmp.lt.s32.totalorder %s2259_s14, 3 }
   0xd   : > { %s2388_s22 = scalar_select %p247_p7, %s2247_s11, %s249_s18  }
   0xe   : > { %p335_p10 = pnand %p1833_p6, %p334_p9 }
   0xf   : > { %v438_v0 = vld [vmem:[%s3102_s3 + $0x80] sm:$0xff] (!%p335_p10)  ;;  %v439_v1 = vld [vmem:[%s3102_s3 + $0x88] sm:$0xff] (!%p335_p10)  ;;  %p386_p11 = scmp.lt.s32.totalorder (!%p335_p10), %s2251_s12, 1  ;;  %v440_v5 = vld [vmem:[%s3102_s3 + $0x90] sm:$0xff] (!%p335_p10)  ;;  %v2261_v7 = vmov (!%p335_p10), 1   ;;  %v2262_v41 = vmov (!%p335_p10), 0  }
  0x10   : > { %338 = sbr.rel (%p335_p10) target bundleno = 2029 (0x7ed), region = 56  ;;  %v422_v2 = vld [vmem:[%s3102_s3] sm:$0xff] (!%p335_p10)  ;;  %v1978_v3 = vpack.c.bf16 (!%p335_p10), %v439_v1, %v438_v0  ;;  %v423_v4 = vld [vmem:[%s3102_s3 + $0x8] sm:$0xff] (!%p335_p10)  ;;  %v441_v6 = vld [vmem:[%s3102_s3 + $0x98] sm:$0xff] (!%p335_p10)  ;;  %2126 = vset.pattern.permute.xlu1 (!%p335_p10), %v2261_v7  ;;  %2128 = vset.pattern.permute.xlu0 (!%p335_p10), %v2261_v7  ;;  %v2263_v48 = vmov (!%p335_p10), 2   ;;  %vm543_vm0 = vcmask (!%p335_p10), 1047808  }
  0x11   : > { %v1980_v8 = vpack.c.bf16 (!%p335_p10), %v423_v4, %v422_v2  ;;  %v1982_v9 = vpack.c.bf16 (!%p335_p10), %v441_v6, %v440_v5  ;;  %v424_v10 = vld [vmem:[%s3102_s3 + $0x10] sm:$0xff] (!%p335_p10)  ;;  %v425_v11 = vld [vmem:[%s3102_s3 + $0x18] sm:$0xff] (!%p335_p10)  ;;  %v442_v12 = vld [vmem:[%s3102_s3 + $0xa0] sm:$0xff] (!%p335_p10)  ;;  %s3114_s24 = smov (!%p335_p10), 126   ;;  %s3112_s25 = smov (!%p335_p10), 99   ;;  %vm895_vm15 = vcmask (!%p335_p10), 261120  }
  0x12   : > { %1979 = vmatprep.subr.bf16.mxu0 (!%p335_p10), %v1978_v3  ;;  %v443_v13 = vld [vmem:[%s3102_s3 + $0xa8] sm:$0xff] (!%p335_p10)  ;;  %v1984_v14 = vpack.c.bf16 (!%p335_p10), %v425_v11, %v424_v10  ;;  %v426_v16 = vld [vmem:[%s3102_s3 + $0x20] sm:$0xff] (!%p335_p10)  ;;  %v444_v18 = vld [vmem:[%s3102_s3 + $0xb0] sm:$0xff] (!%p335_p10)  ;;  %s2271_s26 = smov (!%p335_p10), 98   ;;  %s2272_s27 = smov (!%p335_p10), 97  }
  0x13   : > { %1981 = vmatpush3.bf16.msra.mxu0 (!%p335_p10), %v1980_v8  ;;  %v1986_v15 = vpack.c.bf16 (!%p335_p10), %v443_v13, %v442_v12  ;;  %v427_v17 = vld [vmem:[%s3102_s3 + $0x28] sm:$0xff] (!%p335_p10)  ;;  %v445_v19 = vld [vmem:[%s3102_s3 + $0xb8] sm:$0xff] (!%p335_p10)  ;;  %v428_v22 = vld [vmem:[%s3102_s3 + $0x30] sm:$0xff] (!%p335_p10)  ;;  %v2265_v12 = vmov (!%p335_p10), 3   ;;  %v2266_v13 = vmov (!%p335_p10), 4   ;;  %s2273_s28 = smov (!%p335_p10), 96  }
  0x14   : > { %1983 = vmatprep.subr.bf16.mxu0 (!%p335_p10), %v1982_v9  ;;  %v1988_v20 = vpack.c.bf16 (!%p335_p10), %v427_v17, %v426_v16  ;;  %v1990_v21 = vpack.c.bf16 (!%p335_p10), %v445_v19, %v444_v18  ;;  %v429_v23 = vld [vmem:[%s3102_s3 + $0x38] sm:$0xff] (!%p335_p10)  ;;  %v446_v24 = vld [vmem:[%s3102_s3 + $0xc0] sm:$0xff] (!%p335_p10)  ;;  %v447_v25 = vld [vmem:[%s3102_s3 + $0xc8] sm:$0xff] (!%p335_p10)  ;;  %s2274_s29 = smov (!%p335_p10), 127   ;;  %s3120_s18 = smov (!%p335_p10), 125  }
  0x15   : > { %v1992_v27 = vpack.c.bf16 (!%p335_p10), %v429_v23, %v428_v22  ;;  %v1994_v28 = vpack.c.bf16 (!%p335_p10), %v447_v25, %v446_v24  ;;  %v430_v29 = vld [vmem:[%s3102_s3 + $0x40] sm:$0xff] (!%p335_p10)  ;;  %v431_v30 = vld [vmem:[%s3102_s3 + $0x48] sm:$0xff] (!%p335_p10)  ;;  %v448_v32 = vld [vmem:[%s3102_s3 + $0xd0] sm:$0xff] (!%p335_p10)  ;;  %s2278_s16 = smov (!%p335_p10), 1  }
  0x16   : > { %v2463_v31 = vld [vmem:[%s3100_s1] sm:$0xff] (!%p335_p10)  ;;  %v449_v33 = vld [vmem:[%s3102_s3 + $0xd8] sm:$0xff] (!%p335_p10)  ;;  %v1996_v34 = vpack.c.bf16 (!%p335_p10), %v431_v30, %v430_v29  ;;  %v2475_v35 = vld [vmem:[%s3100_s1 + $0x8] sm:$0xff] (!%p335_p10) }
  0x17   : > { %s387_s15 = scalar_select %p386_p11, %s2251_s12, 1  ;;  %1985 = vmatpush3.bf16.msra.mxu0 %v1984_v14  ;;  %641 = vperm.xlu1 %2126, %v2463_v31   ;;  %v1998_v36 = vpack.c.bf16 %v449_v33, %v448_v32  ;;  %v432_v37 = vld [vmem:[%s3102_s3 + $0x50] sm:$0xff]  ;;  %v433_v38 = vld [vmem:[%s3102_s3 + $0x58] sm:$0xff]  ;;  %v450_v39 = vld [vmem:[%s3102_s3 + $0xe0] sm:$0xff]  ;;  %v2267_v14 = vmov 6  }
  0x18   : > { %1987 = vmatprep.subr.bf16.mxu0 %v1986_v15  ;;  %v451_v40 = vld [vmem:[%s3102_s3 + $0xe8] sm:$0xff]  ;;  %v2000_v42 = vpack.c.bf16 %v433_v38, %v432_v37  ;;  %v434_v44 = vld [vmem:[%s3102_s3 + $0x60] sm:$0xff]  ;;  %v452_v46 = vld [vmem:[%s3102_s3 + $0xf0] sm:$0xff] }
  0x19   : > { %s1866_s20 = sshll.u32 %s387_s15, 6  ;;  %v2002_v43 = vpack.c.bf16 %v451_v40, %v450_v39  ;;  %v435_v45 = vld [vmem:[%s3102_s3 + $0x68] sm:$0xff]  ;;  %v453_v47 = vld [vmem:[%s3102_s3 + $0xf8] sm:$0xff]  ;;  %v436_v51 = vld [vmem:[%s3102_s3 + $0x70] sm:$0xff] }
  0x1a   : > { %s2439_s17 = scalar_lea.vmem %s3099_s0, %s1866_s20  ;;  %v2004_v49 = vpack.c.bf16 %v435_v45, %v434_v44  ;;  %v2006_v50 = vpack.c.bf16 %v453_v47, %v452_v46  ;;  %v437_v52 = vld [vmem:[%s3102_s3 + $0x78] sm:$0xff]  ;;  %s2264_s20 = smov 32   ;;  %v541_v10 = vld [vmem:[%s3100_s1 + $0x10] sm:$0xff] }
  0x1b   : > { %v415_v26 = vld [vmem:[%s2439_s17 + $0x8] sm:$0xff]  ;;  %1989 = vmatpush3.bf16.msra.mxu0 %v1988_v20  ;;  %2127 = vset.pattern.permute.xlu1 %v2262_v41  ;;  %v2008_v53 = vpack.c.bf16 %v437_v52, %v436_v51  ;;  %v414_v54 = vld [vmem:[%s2439_s17] sm:$0xff]  ;;  %v417_v55 = vld [vmem:[%s2439_s17 + $0x18] sm:$0xff] }
  0x1c   : > { %518 = vmatprep.mubr.f32.mxu0 %v415_v26  ;;  %1991 = vmatprep.subr.bf16.mxu0 %v1990_v21  ;;  %v416_v56 = vld [vmem:[%s2439_s17 + $0x10] sm:$0xff]  ;;  %v419_v57 = vld [vmem:[%s2439_s17 + $0x28] sm:$0xff]  ;;  %v418_v58 = vld [vmem:[%s2439_s17 + $0x20] sm:$0xff]  ;;  %v2268_v26 = vmov 5  }
  0x1d   : > { %599 = vperm.xlu1 %2127, %v2475_v35   ;;  %v421_v59 = vld [vmem:[%s2439_s17 + $0x38] sm:$0xff]  ;;  %v420_v60 = vld [vmem:[%s2439_s17 + $0x30] sm:$0xff]  ;;  %v891_v52 = vld [vmem:[%s3104_s5] sm:$0xff] }
  0x1e   : > { %v542_v11 = vld [vmem:[%s3100_s1 + $0x18] sm:$0xff] }
  0x1f   : > { %1993 = vmatpush3.bf16.msra.mxu0 %v1992_v27 }
  0x20   : > { %1995 = vmatprep.subr.bf16.mxu0 %v1994_v28 }
  0x21   : > { %2130 = vset.pattern.permute.xlu1 %v2263_v48 }
  0x22   : > { %685 = vperm.xlu1 %2130, %v2463_v31  }
  0x23   : > { %1997 = vmatpush3.bf16.msra.mxu0 %v1996_v34 }
  0x24   : > { %1999 = vmatprep.subr.bf16.mxu0 %v1998_v36 }
  0x27   : > { %2001 = vmatpush3.bf16.msra.mxu0 %v2000_v42 }
  0x28   : > { %2003 = vmatprep.subr.bf16.mxu0 %v2002_v43 }
  0x2b   : > { %2005 = vmatpush3.bf16.msra.mxu0 %v2004_v49 }
  0x2c   : > { %2007 = vmatprep.subr.bf16.mxu0 %v2006_v50 }
  0x2f   : > { %2009 = vmatpush3.bf16.msra.mxu0 %v2008_v53  ;;  %v892_v53 = vld [vmem:[%s3104_s5 + $0x8] sm:$0xff] }
  0x32   : > { %519 = vmatmul.mubr.f32.vlgmr.msra.gmra.mrb[0].mxu0 %v414_v54 }
  0x33   : > { %523 = vmatprep.mubr.f32.mxu0 %v417_v55  ;;  %v2010_v55 = vpack.c.bf16 %v892_v53, %v891_v52 }
  0x35   : > { %2011 = vmatprep.subr.bf16.mxu1 %v2010_v55 }
  0x36   : > { %524 = vmatmul.mubr.f32.gmra.mrb[2].mxu0 %v416_v56  ;;  %2013 = vmatpush3.bf16.msra.mxu1 %v2010_v55  ;;  %v893_v56 = vld [vmem:[%s3104_s5 + $0x10] sm:$0xff] }
  0x37   : > { %528 = vmatprep.mubr.f32.mxu0 %v419_v57  ;;  %v894_v57 = vld [vmem:[%s3104_s5 + $0x18] sm:$0xff] }
  0x3a   : > { %529 = vmatmul.mubr.f32.gmra.mrb[4].mxu0 %v418_v58  ;;  %v2014_v58 = vpack.c.bf16 %v894_v57, %v893_v56 }
  0x3b   : > { %533 = vmatprep.mubr.f32.mxu0 %v421_v59  ;;  %v883_v59 = vld [vmem:[%s3103_s4] sm:$0xff] }
  0x3c   : > { %2015 = vmatprep.subr.bf16.mxu1 %v2014_v58 }
  0x3d   : > { %2017 = vmatpush3.bf16.msra.mxu1 %v2014_v58 }
  0x3e   : > { %534 = vmatmul.mubr.f32.gmra.mrb[6].mxu0 %v420_v60  ;;  %v884_v60 = vld [vmem:[%s3103_s4 + $0x8] sm:$0xff] }
  0x96   : > { %v2552_v15 = vpop.permute.xlu1 %641 }
  0x9c   : > { %v2554_v16 = vpop.permute.xlu1 %599 }
  0xa1   : > { %v2559_v19 = vpop.permute.xlu1 %685 }
 0x105   : > { %v1900_v61 = vpop.f32.mrb[0].mxu0 }
 0x106   : > { %v1901_v62 = vpop.f32.mrb[1].mxu0 }
 0x107   : > { %v2517_v63 = vadd.f32 %v1901_v62, %v1900_v61  ;;  %v2659_v61 = vpack.c.bf16 %v884_v60, %v883_v59 }
 0x109   : > { %v1903_v0 = vpop.f32.mrb[2].mxu0  ;;  %544 = vrot.lane.b32.xlu0 %v2517_v63, %s2264_s20  ;;  %2019 = vmatprep.subr.bf16.mxu1 %v2659_v61 }
 0x10a   : > { %v1904_v1 = vpop.f32.mrb[3].mxu0 }
 0x10b   : > { %v2521_v2 = vadd.f32 %v1904_v1, %v1903_v0 }
 0x10d   : > { %v1906_v3 = vpop.f32.mrb[4].mxu0  ;;  %547 = vrot.lane.b32.xlu0 %v2521_v2, %s2264_s20 }
 0x10e   : > { %v1907_v4 = vpop.f32.mrb[5].mxu0 }
 0x10f   : > { %v2525_v5 = vadd.f32 %v1907_v4, %v1906_v3 }
 0x111   : > { %v1909_v6 = vpop.f32.mrb[6].mxu0  ;;  %550 = vrot.lane.b32.xlu1 %v2525_v5, %s2264_s20  ;;  %645 = vperm.xlu0 %2128, %v2475_v35  }
 0x112   : > { %v1910_v8 = vpop.f32.mrb[7].mxu0 }
 0x113   : > { %v2530_v9 = vadd.f32 %v1910_v8, %v1909_v6 }
 0x115   : > { %553 = vrot.lane.b32.xlu1 %v2530_v9, %s2264_s20  ;;  %2129 = vset.pattern.permute.xlu0 %v2262_v41 }
 0x116   : > { %594 = vperm.xlu0 %2129, %v2463_v31  }
 0x119   : > { %689 = vperm.xlu1 %2130, %v2475_v35  }
 0x11a   : > { %604 = vperm.xlu0 %2129, %v541_v10  }
 0x11d   : > { %2131 = vset.pattern.permute.xlu1 %v2261_v7 }
 0x11e   : > { %649 = vperm.xlu1 %2131, %v541_v10   ;;  %609 = vperm.xlu0 %2129, %v542_v11  }
 0x122   : > { %2132 = vset.pattern.permute.xlu1 %v2265_v12  ;;  %2134 = vset.pattern.permute.xlu0 %v2263_v48 }
 0x123   : > { %728 = vperm.xlu1 %2132, %v2463_v31   ;;  %693 = vperm.xlu0 %2134, %v541_v10  }
 0x127   : > { %2133 = vset.pattern.permute.xlu1 %v2261_v7  ;;  %2137 = vset.pattern.permute.xlu0 %v2266_v13 }
 0x128   : > { %653 = vperm.xlu1 %2133, %v542_v11   ;;  %776 = vperm.xlu0 %2137, %v2475_v35  }
 0x12c   : > { %2135 = vset.pattern.permute.xlu1 %v2266_v13  ;;  %780 = vperm.xlu0 %2137, %v541_v10  }
 0x12d   : > { %772 = vperm.xlu1 %2135, %v2463_v31  }
 0x131   : > { %2136 = vset.pattern.permute.xlu1 %v2263_v48 }
 0x132   : > { %697 = vperm.xlu1 %2136, %v542_v11  }
 0x136   : > { %2138 = vset.pattern.permute.xlu1 %v2265_v12 }
 0x137   : > { %736 = vperm.xlu1 %2138, %v541_v10  }
 0x13b   : > { %740 = vperm.xlu1 %2138, %v542_v11  }
 0x13f   : > { %2139 = vset.pattern.permute.xlu1 %v2267_v14 }
 0x140   : > { %860 = vperm.xlu1 %2139, %v2463_v31  }
 0x17b   : > { %v545_v17 = vpop.permute.xlu0 %544 }
 0x17c   : > { %v546_v18 = vsel %vm543_vm0, %v545_v17, %v2517_v63 }
 0x17d   : > { %556 = vrot.lane.b32.xlu0 %v546_v18, %s2264_s20 }
 0x17f   : > { %v548_v20 = vpop.permute.xlu0 %547 }
 0x180   : > { %v549_v21 = vsel %vm543_vm0, %v548_v20, %v2521_v2 }
 0x181   : > { %558 = vrot.lane.b32.xlu1 %v549_v21, %s2264_s20 }
 0x183   : > { %v551_v22 = vpop.permute.xlu1 %550 }
 0x184   : > { %v552_v23 = vsel %vm543_vm0, %v551_v22, %v2525_v5 }
 0x185   : > { %560 = vrot.lane.b32.xlu0 %v552_v23, %s2264_s20  ;;  %864 = vperm.xlu1 %2139, %v2475_v35  }
 0x187   : > { %v554_v24 = vpop.permute.xlu1 %553 }
 0x188   : > { %v555_v25 = vsel %vm543_vm0, %v554_v24, %v2530_v9 }
 0x189   : > { %784 = vperm.xlu0 %2137, %v542_v11   ;;  %868 = vperm.xlu1 %2139, %v541_v10  }
 0x18d   : > { %562 = vrot.lane.b32.xlu1 %v555_v25, %s2264_s20  ;;  %2140 = vset.pattern.permute.xlu0 %v2268_v26  ;;  %s3110_s20 = smov 125  }
 0x18e   : > { %816 = vperm.xlu0 %2140, %v2463_v31   ;;  %2143 = vset.pattern.permute.xlu1 %v2261_v7 }
 0x190   : > { %v2580_v29 = vpop.permute.xlu0 %645 }
 0x192   : > { %820 = vperm.xlu0 %2140, %v2475_v35  }
 0x195   : > { %v2584_v31 = vpop.permute.xlu0 %594 }
 0x196   : > { %824 = vperm.xlu0 %2140, %v541_v10  }
 0x198   : > { %v2576_v27 = vpop.permute.xlu1 %689 }
 0x199   : > { %v2588_v33 = vpop.permute.xlu0 %604 }
 0x19a   : > { %828 = vperm.xlu0 %2140, %v542_v11  }
 0x19d   : > { %v2578_v28 = vpop.permute.xlu1 %649  ;;  %v2592_v36 = vpop.permute.xlu0 %609 }
 0x19e   : > { %2141 = vset.pattern.permute.xlu0 %v2267_v14 }
 0x19f   : > { %872 = vperm.xlu0 %2141, %v542_v11   ;;  %v2277_v11 = vmov 32  }
 0x1a2   : > { %v2582_v30 = vpop.permute.xlu1 %728 }
 0x1a3   : > { %2142 = vset.pattern.permute.xlu0 %v2265_v12 }
 0x1a4   : > { %732 = vperm.xlu0 %2142, %v2475_v35   ;;  %v2596_v35 = vpop.permute.xlu0 %693 }
 0x1a7   : > { %v2586_v32 = vpop.permute.xlu1 %653 }
 0x1a8   : > { %v2600_v39 = vpop.permute.xlu0 %776 }
 0x1ac   : > { %v2590_v34 = vpop.permute.xlu1 %772  ;;  %v2604_v41 = vpop.permute.xlu0 %780 }
 0x1b1   : > { %v2594_v37 = vpop.permute.xlu1 %697 }
 0x1b6   : > { %v2598_v38 = vpop.permute.xlu1 %736 }
 0x1ba   : > { %v2602_v40 = vpop.permute.xlu1 %740 }
 0x1bf   : > { %v2606_v42 = vpop.permute.xlu1 %860 }
 0x1ef   : > { %v557_v43 = vpop.permute.xlu0 %556 }
 0x1f0   : > { %v564_v44 = vsel %vm543_vm0, %v557_v43, %v2517_v63 }
 0x1f1   : > { %799 = vrot.lane.b32.xlu0 %v564_v44, %s3114_s24  ;;  %576 = vrot.lane.b32.xlu1 %v564_v44, %s3112_s25 }
 0x1f3   : > { %v559_v45 = vpop.permute.xlu1 %558 }
 0x1f4   : > { %v565_v46 = vsel %vm543_vm0, %v559_v45, %v2521_v2  ;;  %v409_v2 = vlaneseq }
 0x1f5   : > { %626 = vrot.lane.b32.xlu0 %v565_v46, %s2271_s26  ;;  %624 = vrot.lane.b32.xlu1 %v564_v44, %s2271_s26 }
 0x1f6   : > { %v2673_v4 = vand.u32 127, %v409_v2 }
 0x1f7   : > { %v561_v47 = vpop.permute.xlu0 %560 }
 0x1f8   : > { %v566_v48 = vsel %vm543_vm0, %v561_v47, %v2525_v5  ;;  %vm411_vm1 = vcmp.lt.s32.totalorder %v2673_v4, 16  ;;  %v620_v5 = vadd.s32 4294967294, %v2673_v4  ;;  %v568_v8 = vadd.s32 4294967293, %v2673_v4 }
 0x1f9   : > { %668 = vrot.lane.b32.xlu1 %v564_v44, %s2272_s27  ;;  %628 = vrot.lane.b32.xlu0 %v566_v48, %s2271_s26  ;;  %v2684_v13 = vsel %vm411_vm1, 16, %v2277_v11  ;;  %v664_v14 = vadd.s32 4294967295, %v2673_v4  ;;  %v2707_v43 = vadd.s32 2, %v2673_v4  ;;  %v2715_v47 = vadd.s32 1, %v2673_v4 }
 0x1fa   : > { %vm622_vm3 = vcmp.lt.s32.totalorder %v620_v5, %v2684_v13  ;;  %vm570_vm5 = vcmp.lt.s32.totalorder %v568_v8, %v2684_v13  ;;  %vm709_vm11 = vcmp.lt.s32.totalorder %v2673_v4, %v2684_v13  ;;  %v2728_v55 = vadd.s32 3, %v2673_v4 }
 0x1fb   : > { %vm666_vm7 = vcmp.lt.s32.totalorder %v664_v14, %v2684_v13  ;;  %vm797_vm12 = vcmp.lt.s32.totalorder %v2707_v43, %v2684_v13  ;;  %vm753_vm13 = vcmp.lt.s32.totalorder %v2715_v47, %v2684_v13 }
 0x1fc   : > { %vm841_vm14 = vcmp.lt.s32.totalorder %v2728_v55, %v2684_v13 }
 0x1fd   : > { %711 = vrot.lane.b32.xlu1 %v564_v44, %s2273_s28  ;;  %672 = vrot.lane.b32.xlu0 %v566_v48, %s2272_s27 }
 0x201   : > { %755 = vrot.lane.b32.xlu1 %v564_v44, %s2274_s29  ;;  %803 = vrot.lane.b32.xlu0 %v566_v48, %s3114_s24  ;;  %s2281_s24 = smov 112  }
 0x204   : > { %v2621_v49 = vpop.permute.xlu1 %864 }
 0x205   : > { %843 = vrot.lane.b32.xlu1 %v564_v44, %s3110_s20  ;;  %s2279_s20 = smov 3  }
 0x208   : > { %v2624_v50 = vpop.permute.xlu1 %868  ;;  %v2665_v62 = vpop.permute.xlu0 %784 }
 0x209   : > { %578 = vrot.lane.b32.xlu1 %v565_v46, %s3112_s25  ;;  %s3121_s25 = smov 99  }
 0x20c   : > { %v563_v51 = vpop.permute.xlu1 %562 }
 0x20d   : > { %v567_v54 = vsel %vm543_vm0, %v563_v51, %v2530_v9  ;;  %670 = vrot.lane.b32.xlu1 %v565_v46, %s2272_s27  ;;  %v817_v63 = vpop.permute.xlu0 %816  ;;  %v2276_v9 = vmov 16   ;;  %vm1463_vm0 = vcmask 130048  }
 0x20e   : > { %630 = vrot.lane.b32.xlu0 %v567_v54, %s2271_s26  ;;  %s3119_s26 = smov 126   ;;  %v412_v10 = vsel %vm411_vm1, 0, %v2276_v9 }
 0x20f   : > { %vm621_vm2 = vcmp.ge.s32.totalorder %v620_v5, %v412_v10  ;;  %vm569_vm4 = vcmp.ge.s32.totalorder %v568_v8, %v412_v10  ;;  %vm665_vm6 = vcmp.ge.s32.totalorder %v664_v14, %v412_v10 }
 0x210   : > { %vm2690_vm8 = vmand %vm621_vm2, %vm622_vm3 }
 0x211   : > { %713 = vrot.lane.b32.xlu1 %v565_v46, %s2273_s28  ;;  %v2667_v0 = vpop.permute.xlu0 %820  ;;  %vm2694_vm9 = vmand %vm569_vm4, %vm570_vm5 }
 0x212   : > { %717 = vrot.lane.b32.xlu0 %v567_v54, %s2273_s28  ;;  %vm2698_vm10 = vmand %vm665_vm6, %vm666_vm7 }
 0x215   : > { %757 = vrot.lane.b32.xlu1 %v565_v46, %s2274_s29  ;;  %v2669_v1 = vpop.permute.xlu0 %824 }
 0x216   : > { %761 = vrot.lane.b32.xlu0 %v567_v54, %s2274_s29 }
 0x219   : > { %801 = vrot.lane.b32.xlu1 %v565_v46, %s3119_s26  ;;  %v2671_v3 = vpop.permute.xlu0 %828 }
 0x21a   : > { %847 = vrot.lane.b32.xlu0 %v566_v48, %s3120_s18 }
 0x21d   : > { %845 = vrot.lane.b32.xlu1 %v565_v46, %s3120_s18 }
 0x21e   : > { %v2677_v6 = vpop.permute.xlu0 %872 }
 0x221   : > { %580 = vrot.lane.b32.xlu1 %v566_v48, %s3121_s25 }
 0x223   : > { %v733_v18 = vpop.permute.xlu0 %732 }
 0x225   : > { %715 = vrot.lane.b32.xlu1 %v566_v48, %s2273_s28 }
 0x229   : > { %759 = vrot.lane.b32.xlu1 %v566_v48, %s2274_s29 }
 0x22d   : > { %582 = vrot.lane.b32.xlu1 %v567_v54, %s3121_s25  ;;  %s2282_s25 = smov [#allocation2]  }
 0x231   : > { %674 = vrot.lane.b32.xlu1 %v567_v54, %s2272_s27  ;;  %s1867_s27 = sshll.u32 %s2251_s12, 10 }
 0x235   : > { %805 = vrot.lane.b32.xlu1 %v567_v54, %s3119_s26  ;;  %s3044_s26 = scalar_lea.hbm %s3108_s9, %s1867_s27 }
 0x239   : > { %849 = vrot.lane.b32.xlu1 %v567_v54, %s3120_s18 }
 0x263   : > { %v577_v17 = vpop.permute.xlu1 %576  ;;  %v800_v45 = vpop.permute.xlu0 %799 }
 0x264   : > { %v588_v26 = vsel %vm2694_vm9, %v577_v17, 0.0  ;;  %v811_v57 = vsel %vm797_vm12, %v800_v45, 0.0 }
 0x265   : > { %v612_v48 = vmul.f32 %v2584_v31, %v588_v26  ;;  %v831_v60 = vmul.f32 %v817_v63, %v811_v57 }
 0x267   : > { %v625_v21 = vpop.permute.xlu1 %624  ;;  %v627_v31 = vpop.permute.xlu0 %626 }
 0x268   : > { %v636_v24 = vsel %vm2690_vm8, %v625_v21, 0.0  ;;  %v637_v26 = vsel %vm2690_vm8, %v627_v31, 0.0 }
 0x269   : > { %v656_v46 = vmul.f32 %v2552_v15, %v636_v24 }
 0x26b   : > { %v669_v25 = vpop.permute.xlu1 %668  ;;  %v660_v54 = vadd.f32 %v656_v46, %v612_v48  ;;  %v629_v9 = vpop.permute.xlu0 %628  ;;  %v657_v48 = vmul.f32 %v2580_v29, %v637_v26 }
 0x26c   : > { %v680_v44 = vsel %vm2698_vm10, %v669_v25, 0.0 }
 0x26d   : > { %v700_v51 = vmul.f32 %v2559_v19, %v680_v44 }
 0x26f   : > { %v712_v52 = vpop.permute.xlu1 %711  ;;  %v704_v56 = vadd.f32 %v700_v51, %v660_v54  ;;  %v673_v21 = vpop.permute.xlu0 %672 }
 0x270   : > { %v723_v53 = vsel %vm709_vm11, %v712_v52, 0.0 }
 0x271   : > { %v743_v15 = vmul.f32 %v2582_v30, %v723_v53 }
 0x273   : > { %v756_v19 = vpop.permute.xlu1 %755  ;;  %v747_v59 = vadd.f32 %v743_v15, %v704_v56  ;;  %v804_v44 = vpop.permute.xlu0 %803 }
 0x274   : > { %v767_v58 = vsel %vm753_vm13, %v756_v19, 0.0 }
 0x275   : > { %v787_v30 = vmul.f32 %v2590_v34, %v767_v58 }
 0x277   : > { %v791_v2 = vadd.f32 %v787_v30, %v747_v59  ;;  %v844_v5 = vpop.permute.xlu1 %843 }
 0x278   : > { %v855_v8 = vsel %vm841_vm14, %v844_v5, 0.0  ;;  %v885_v5 = vld [vmem:[%s3103_s4 + $0x10] sm:$0xff] }
 0x279   : > { %v835_v10 = vadd.f32 %v831_v60, %v791_v2  ;;  %v875_v11 = vmul.f32 %v2606_v42, %v855_v8 }
 0x27b   : > { %v2743_v14 = vadd.f32 %v875_v11, %v835_v10  ;;  %v579_v17 = vpop.permute.xlu1 %578  ;;  %v682_v11 = vsel %vm2698_vm10, %v673_v21, 0.0 }
 0x27c   : > { %v589_v63 = vsel %vm2694_vm9, %v579_v17, 0.0 }
 0x27d   : > { %v887_v34 = vmul.f32 %v2743_v14, %v2743_v14  ;;  %v613_v45 = vmul.f32 %v2554_v16, %v589_v63 }
 0x27f   : > { %v671_v24 = vpop.permute.xlu1 %670  ;;  %1944 = vmatprep.mubr.msk.f32.mxu1 %vm895_vm15, %v887_v34  ;;  %v661_v54 = vadd.f32 %v657_v48, %v613_v45 }
 0x280   : > { %v681_v42 = vsel %vm2698_vm10, %v671_v24, 0.0  ;;  %v631_v15 = vpop.permute.xlu0 %630 }
 0x281   : > { %v701_v51 = vmul.f32 %v2576_v27, %v681_v42 }
 0x283   : > { %v714_v25 = vpop.permute.xlu1 %713  ;;  %v705_v56 = vadd.f32 %v701_v51, %v661_v54 }
 0x284   : > { %v724_v46 = vsel %vm709_vm11, %v714_v25, 0.0  ;;  %v718_v27 = vpop.permute.xlu0 %717  ;;  %v702_v25 = vmul.f32 %v2596_v35, %v682_v11  ;;  %v813_v35 = vsel %vm797_vm12, %v804_v44, 0.0  ;;  %v1092_v11 = vld [vmem:[%s3101_s2 + $0x10] sm:$0xff] }
 0x285   : > { %v744_v31 = vmul.f32 %v733_v18, %v724_v46 }
 0x287   : > { %v758_v52 = vpop.permute.xlu1 %757  ;;  %v748_v58 = vadd.f32 %v744_v31, %v705_v56  ;;  %v639_v31 = vsel %vm2690_vm8, %v631_v15, 0.0 }
 0x288   : > { %v768_v53 = vsel %vm753_vm13, %v758_v52, 0.0 }
 0x289   : > { %v788_v19 = vmul.f32 %v2600_v39, %v768_v53  ;;  %v638_v39 = vsel %vm2690_vm8, %v629_v9, 0.0  ;;  %v762_v9 = vpop.permute.xlu0 %761 }
 0x28a   : > { %v658_v17 = vmul.f32 %v2578_v28, %v638_v39 }
 0x28b   : > { %v802_v16 = vpop.permute.xlu1 %801  ;;  %v792_v59 = vadd.f32 %v788_v19, %v748_v58 }
 0x28c   : > { %v812_v57 = vsel %vm797_vm12, %v802_v16, 0.0 }
 0x28d   : > { %v832_v29 = vmul.f32 %v2667_v0, %v812_v57  ;;  %v886_v0 = vld [vmem:[%s3103_s4 + $0x18] sm:$0xff] }
 0x28e   : > { %v2022_v63 = vpack.c.bf16 %v886_v0, %v885_v5 }
 0x28f   : > { %v846_v30 = vpop.permute.xlu1 %845  ;;  %v836_v2 = vadd.f32 %v832_v29, %v792_v59 }
 0x290   : > { %v856_v60 = vsel %vm841_vm14, %v846_v30, 0.0 }
 0x291   : > { %v876_v18 = vmul.f32 %v2621_v49, %v856_v60 }
 0x293   : > { %v2780_v8 = vadd.f32 %v876_v18, %v836_v2  ;;  %v581_v10 = vpop.permute.xlu1 %580 }
 0x294   : > { %v590_v49 = vsel %vm2694_vm9, %v581_v10, 0.0  ;;  %v1091_v10 = vld [vmem:[%s3101_s2 + $0x8] sm:$0xff] }
 0x295   : > { %v614_v34 = vmul.f32 %v2588_v33, %v590_v49  ;;  %v888_v24 = vmul.f32 %v2780_v8, %v2780_v8  ;;  %v848_v33 = vpop.permute.xlu0 %847  ;;  %v1093_v49 = vld [vmem:[%s3101_s2 + $0x18] sm:$0xff] }
 0x297   : > { %v662_v26 = vadd.f32 %v658_v17, %v614_v34  ;;  %v716_v42 = vpop.permute.xlu1 %715  ;;  %1945 = vmatmul.mubr.msk.f32.vlgmr.msra.gmra.mrb[0].mxu1 %vm895_vm15, %v888_v24 }
 0x298   : > { %v725_v21 = vsel %vm709_vm11, %v716_v42, 0.0  ;;  %2021 = vmatpush3.bf16.msra.mxu1 %v2659_v61  ;;  %v857_v61 = vsel %vm841_vm14, %v848_v33, 0.0  ;;  %v2914_v33 = vld [vmem:[%s3107_s8 + $0x18] sm:$0xff] }
 0x299   : > { %v706_v28 = vadd.f32 %v702_v25, %v662_v26  ;;  %v745_v45 = vmul.f32 %v2598_v38, %v725_v21  ;;  %2023 = vmatprep.subr.bf16.mxu1 %v2022_v63  ;;  %v833_v38 = vmul.f32 %v2669_v1, %v813_v35  ;;  %v877_v56 = vmul.f32 %v2624_v50, %v857_v61  ;;  %v2890_v21 = vld [vmem:[%s3107_s8] sm:$0xff] }
 0x29a   : > { %v726_v1 = vsel %vm709_vm11, %v718_v27, 0.0 }
 0x29b   : > { %v760_v46 = vpop.permute.xlu1 %759  ;;  %v749_v51 = vadd.f32 %v745_v45, %v706_v28  ;;  %v2898_v28 = vld [vmem:[%s3107_s8 + $0x10] sm:$0xff]  ;;  %v2906_v45 = vld [vmem:[%s3107_s8 + $0x8] sm:$0xff] }
 0x29c   : > { %v769_v48 = vsel %vm753_vm13, %v760_v46, 0.0  ;;  %2025 = vmatpush3.bf16.msra.mxu1 %v2022_v63 }
 0x29d   : > { %v789_v52 = vmul.f32 %v2604_v41, %v769_v48  ;;  %v659_v41 = vmul.f32 %v2586_v32, %v639_v31  ;;  %v770_v32 = vsel %vm753_vm13, %v762_v9, 0.0 }
 0x29e   : > { %v790_v27 = vmul.f32 %v2665_v62, %v770_v32  ;;  %v1090_v62 = vld [vmem:[%s3101_s2] sm:$0xff] }
 0x29f   : > { %v793_v53 = vadd.f32 %v789_v52, %v749_v51  ;;  %v583_v54 = vpop.permute.xlu1 %582 }
 0x2a0   : > { %v591_v44 = vsel %vm2694_vm9, %v583_v54, 0.0 }
 0x2a1   : > { %v837_v19 = vadd.f32 %v833_v38, %v793_v53  ;;  %v615_v16 = vmul.f32 %v2592_v36, %v591_v44  ;;  %v746_v36 = vmul.f32 %v2602_v40, %v726_v1 }
 0x2a3   : > { %v2815_v57 = vadd.f32 %v877_v56, %v837_v19  ;;  %v675_v58 = vpop.permute.xlu1 %674  ;;  %v663_v15 = vadd.f32 %v659_v41, %v615_v16 }
 0x2a4   : > { %v683_v20 = vsel %vm2698_vm10, %v675_v58, 0.0 }
 0x2a5   : > { %v703_v22 = vmul.f32 %v2594_v37, %v683_v20  ;;  %v889_v50 = vmul.f32 %v2815_v57, %v2815_v57 }
 0x2a7   : > { %v707_v29 = vadd.f32 %v703_v22, %v663_v15  ;;  %v806_v59 = vpop.permute.xlu1 %805  ;;  %1947 = vmatprep.mubr.msk.f32.mxu1 %vm895_vm15, %v889_v50 }
 0x2a8   : > { %v814_v23 = vsel %vm797_vm12, %v806_v59, 0.0 }
 0x2a9   : > { %v750_v37 = vadd.f32 %v746_v36, %v707_v29  ;;  %v834_v60 = vmul.f32 %v2671_v3, %v814_v23 }
 0x2ab   : > { %v794_v30 = vadd.f32 %v790_v27, %v750_v37  ;;  %v850_v2 = vpop.permute.xlu1 %849 }
 0x2ac   : > { %v858_v47 = vsel %vm841_vm14, %v850_v2, 0.0 }
 0x2ad   : > { %v838_v40 = vadd.f32 %v834_v60, %v794_v30  ;;  %v878_v18 = vmul.f32 %v2677_v6, %v858_v47 }
 0x2af   : > { %v2839_v39 = vadd.f32 %v878_v18, %v838_v40 }
 0x2b1   : > { %v890_v43 = vmul.f32 %v2839_v39, %v2839_v39 }
 0x2b3   : > { %1948 = vmatmul.mubr.msk.f32.gmra.mrb[2].mxu1 %vm895_vm15, %v890_v43 }
 0x2b4   : > { %1958 = vmatprep.mubr.msk.f32.mxu1 %vm895_vm15, %v2743_v14 }
 0x2b7   : > { %1959 = vmatmul.mubr.msk.f32.vlgmr.msra.gmra.mrb[0].mxu1 %vm895_vm15, %v2780_v8 }
 0x2b8   : > { %1961 = vmatprep.mubr.msk.f32.mxu1 %vm895_vm15, %v2815_v57 }
 0x2bb   : > { %1962 = vmatmul.mubr.msk.f32.gmra.mrb[2].mxu1 %vm895_vm15, %v2839_v39 }
 0x2bc   : > { %1972 = vmatprep.mubr.msk.f32.mxu1 %vm895_vm15, %v1090_v62 }
 0x38a   : > { %v1960_v3 = vpop.f32.mrb[0].mxu1 }
 0x38b   : > { %v1071_v6 = vpop.f32.mrb[1].mxu1 }
 0x38c   : > { %v2026_v13 = vpack.c.bf16 %v1960_v3, %v1071_v6 }
 0x38e   : > { %v1963_v55 = vpop.f32.mrb[2].mxu1  ;;  %2027 = vmatprep.subr.bf16.mxu1 %v2026_v13 }
 0x38f   : > { %v1081_v5 = vpop.f32.mrb[3].mxu1  ;;  %2029 = vmatpush3.bf16.msra.mxu1 %v2026_v13 }
 0x390   : > { %v2030_v0 = vpack.c.bf16 %v1963_v55, %v1081_v5 }
 0x392   : > { %2031 = vmatprep.subr.bf16.mxu1 %v2030_v0 }
 0x393   : > { %2033 = vmatpush3.bf16.msra.mxu1 %v2030_v0 }
 0x396   : > { %1973 = vmatmul.mubr.msk.f32.vlgmr.msra.gmra.mrb[4].mxu1 %vm895_vm15, %v1091_v10 }
 0x397   : > { %1975 = vmatprep.mubr.msk.f32.mxu1 %vm895_vm15, %v1092_v11 }
 0x39a   : > { %1976 = vmatmul.mubr.msk.f32.gmra.mrb[6].mxu1 %vm895_vm15, %v1093_v49 }
 0x469   : > { %v2868_v17 = vpop.f32.mrb[4].mxu1 }
 0x46a   : > { %v2870_v9 = vpop.f32.mrb[5].mxu1  ;;  %v1192_v25 = vmul.f32 %v2868_v17, %v2868_v17 }
 0x46b   : > { %v1191_v34 = vmul.f32 %v2870_v9, %v2870_v9 }
 0x46d   : > { %1199 = vrot.lane.b32.xlu0 %v1191_v34, %s2278_s16  ;;  %v2875_v24 = vpop.f32.mrb[6].mxu1 }
 0x46e   : > { %v2877_v63 = vpop.f32.mrb[7].mxu1  ;;  %v1194_v42 = vmul.f32 %v2875_v24, %v2875_v24 }
 0x46f   : > { %v1193_v26 = vmul.f32 %v2877_v63, %v2877_v63 }
 0x471   : > { %1201 = vrot.lane.b32.xlu0 %v1192_v25, %s2278_s16  ;;  %1203 = vrot.lane.b32.xlu1 %v1193_v26, %s2278_s16 }
 0x475   : > { %1205 = vrot.lane.b32.xlu1 %v1194_v42, %s2278_s16  ;;  %1235 = vrot.lane.b32.xlu0 %v2890_v21, %s2278_s16 }
 0x479   : > { %1251 = vrot.lane.b32.xlu0 %v2890_v21, %s2279_s20  ;;  %1239 = vrot.lane.b32.xlu1 %v2898_v28, %s2278_s16 }
 0x47d   : > { %1237 = vrot.lane.b32.xlu0 %v2906_v45, %s2278_s16  ;;  %1255 = vrot.lane.b32.xlu1 %v2898_v28, %s2279_s20 }
 0x481   : > { %1253 = vrot.lane.b32.xlu0 %v2906_v45, %s2279_s20  ;;  %1241 = vrot.lane.b32.xlu1 %v2914_v33, %s2278_s16 }
 0x485   : > { %1257 = vrot.lane.b32.xlu1 %v2914_v33, %s2279_s20  ;;  %s382_s20 = sand.u32 1, %s2243_s10  }
 0x486   : > { %s1834_s15 = sshll.u32 %s382_s20, 6  ;;  %s3053_s12 = scalar_lea.sflag [#allocation3], %s382_s20 }
 0x487   : > { %s3026_s23 = scalar_lea.vmem [#allocation2], %s1834_s15 }
 0x488   : > { %s1715_s28 = sshll.u32 %s3026_s23, 4  ;;  %s3046_s28 = int_to_ptr.vmem [resolvable:$true] %s1715_s28 }
 0x489   : > { %s2181_s18 = scalar_lea.vmem %s3046_s28, 1024 }
 0x48a   : > { %p2182_p12 = scmp.ne.s32.totalorder %s3046_s28, %s2181_s18 }
 0x48c   : > { %p2183_p13 = pnand %p2182_p12, %p2375_p4 }
 0x48e   : > { %p2184_p0 = pneg %p2183_p13 }
 0x4df   : > { %v1200_v46 = vpop.permute.xlu0 %1199 }
 0x4e0   : > { %v1211_v35 = vsub.f32 %v2870_v9, %v1200_v46 }
 0x4e2   : > { %v1215_v52 = vmax.f32 %v1211_v35, 0.0 }
 0x4e3   : > { %v1202_v48 = vpop.permute.xlu0 %1201  ;;  %v1204_v51 = vpop.permute.xlu1 %1203 }
 0x4e4   : > { %v1212_v61 = vsub.f32 %v2868_v17, %v1202_v48  ;;  %v1213_v38 = vsub.f32 %v2877_v63, %v1204_v51  ;;  %v1219_v31 = vadd.f32 1e-05, %v1215_v52 }
 0x4e6   : > { %v1216_v53 = vmax.f32 %v1212_v61, 0.0  ;;  %v1217_v56 = vmax.f32 %v1213_v38, 0.0 }
 0x4e7   : > { %v1206_v54 = vpop.permute.xlu1 %1205  ;;  %v1236_v16 = vpop.permute.xlu0 %1235 }
 0x4e8   : > { %v1220_v44 = vadd.f32 1e-05, %v1216_v53  ;;  %v1214_v19 = vsub.f32 %v2875_v24, %v1206_v54  ;;  %v1221_v58 = vadd.f32 1e-05, %v1217_v56 }
 0x4ea   : > { %2149 = vrsqrt.f32 %v1220_v44  ;;  %v1218_v41 = vmax.f32 %v1214_v19, 0.0 }
 0x4eb   : > { %2151 = vrsqrt.f32 %v1219_v31  ;;  %v1240_v20 = vpop.permute.xlu1 %1239  ;;  %v1252_v15 = vpop.permute.xlu0 %1251 }
 0x4ec   : > { %v1222_v1 = vadd.f32 1e-05, %v1218_v41 }
 0x4ee   : > { %2153 = vrsqrt.f32 %v1222_v1  ;;  %v1566_v1 = vld [vmem:[%s3106_s7 + $0x8] sm:$0xff] }
 0x4ef   : > { %2155 = vrsqrt.f32 %v1221_v58  ;;  %v1256_v22 = vpop.permute.xlu1 %1255  ;;  %v1238_v32 = vpop.permute.xlu0 %1237 }
 0x4f3   : > { %v1242_v23 = vpop.permute.xlu1 %1241  ;;  %v1254_v47 = vpop.permute.xlu0 %1253 }
 0x4f4   : > { %v2150_v50 = vpop.eup %2149 }
 0x4f5   : > { %v1248_v36 = vmul.f32 %v2150_v50, %v1238_v32  ;;  %v2152_v29 = vpop.eup %2151  ;;  %v1264_v18 = vmul.f32 %v2150_v50, %v1254_v47  ;;  %v1567_v50 = vld [vmem:[%s3106_s7 + $0x10] sm:$0xff] }
 0x4f6   : > { %v1247_v27 = vmul.f32 %v2152_v29, %v1236_v16  ;;  %v1263_v60 = vmul.f32 %v2152_v29, %v1252_v15  ;;  %v1462_v16 = vld [vmem:[%s3105_s6 + $0x18] sm:$0xff]  ;;  %v1565_v15 = vld [vmem:[%s3106_s7] sm:$0xff] }
 0x4f7   : > { %1313 = vrot.lane.b32.xlu0 %v1248_v36, %s2274_s29  ;;  %v1258_v43 = vpop.permute.xlu1 %1257  ;;  %v2040_v32 = vpack.c.bf16 %v1567_v50, %v1565_v15 }
 0x4f8   : > { %v2154_v59 = vpop.eup %2153 }
 0x4f9   : > { %v1250_v37 = vmul.f32 %v2154_v59, %v1242_v23  ;;  %v2156_v30 = vpop.eup %2155  ;;  %v1266_v62 = vmul.f32 %v2154_v59, %v1258_v43 }
 0x4fa   : > { %v1249_v2 = vmul.f32 %v2156_v30, %v1240_v20  ;;  %v1265_v40 = vmul.f32 %v2156_v30, %v1256_v22  ;;  %v1568_v20 = vld [vmem:[%s3106_s7 + $0x18] sm:$0xff] }
 0x4fb   : > { %1311 = vrot.lane.b32.xlu0 %v1247_v27, %s2274_s29  ;;  %1317 = vrot.lane.b32.xlu1 %v1250_v37, %s2274_s29  ;;  %v2038_v22 = vpack.c.bf16 %v1568_v20, %v1566_v1 }
 0x4fd   : > { %2039 = vmatprep.subr.bf16.mxu0 %v2038_v22 }
 0x4fe   : > { %2041 = vmatpush1.bf16.msra.mxu0 %v2040_v32 }
 0x4ff   : > { %1347 = vrot.lane.b32.xlu0 %v1263_v60, %s2274_s29  ;;  %1315 = vrot.lane.b32.xlu1 %v1249_v2, %s2274_s29 }
 0x503   : > { %1349 = vrot.lane.b32.xlu0 %v1264_v18, %s2274_s29  ;;  %1351 = vrot.lane.b32.xlu1 %v1265_v40, %s2274_s29 }
 0x507   : > { %1353 = vrot.lane.b32.xlu1 %v1266_v62, %s2274_s29 }
 0x569   : > { %v1314_v3 = vpop.permute.xlu0 %1313 }
 0x56a   : > { %v1324_v6 = vmul.f32 %v2868_v17, %v1314_v3 }
 0x56c   : > { %1333 = vrot.lane.b32.xlu0 %v1324_v6, %s2278_s16 }
 0x56d   : > { %v1312_v13 = vpop.permute.xlu0 %1311  ;;  %v1318_v55 = vpop.permute.xlu1 %1317 }
 0x56e   : > { %v1323_v5 = vmul.f32 %v1312_v13, %v2870_v9  ;;  %v1326_v0 = vmul.f32 %v2875_v24, %v1318_v55 }
 0x570   : > { %1331 = vrot.lane.b32.xlu0 %v1323_v5, %s2278_s16  ;;  %1337 = vrot.lane.b32.xlu1 %v1326_v0, %s2278_s16 }
 0x571   : > { %v1348_v10 = vpop.permute.xlu0 %1347  ;;  %v1316_v11 = vpop.permute.xlu1 %1315 }
 0x572   : > { %v1359_v49 = vmul.f32 %v1348_v10, %v2870_v9  ;;  %v1325_v34 = vmul.f32 %v1316_v11, %v2877_v63 }
 0x574   : > { %1367 = vrot.lane.b32.xlu0 %v1359_v49, %s2274_s29  ;;  %1335 = vrot.lane.b32.xlu1 %v1325_v34, %s2278_s16 }
 0x575   : > { %v1350_v25 = vpop.permute.xlu0 %1349  ;;  %v1352_v26 = vpop.permute.xlu1 %1351 }
 0x576   : > { %v1360_v42 = vmul.f32 %v2868_v17, %v1350_v25  ;;  %v1361_v46 = vmul.f32 %v1352_v26, %v2877_v63 }
 0x578   : > { %1369 = vrot.lane.b32.xlu0 %v1360_v42, %s2274_s29  ;;  %1371 = vrot.lane.b32.xlu1 %v1361_v46, %s2274_s29 }
 0x579   : > { %v1354_v35 = vpop.permute.xlu1 %1353 }
 0x57a   : > { %v1362_v48 = vmul.f32 %v2875_v24, %v1354_v35 }
 0x57c   : > { %1299 = vperm.xlu0 %2142, %v1265_v40   ;;  %1373 = vrot.lane.b32.xlu1 %v1362_v48, %s2274_s29 }
 0x580   : > { %1304 = vperm.xlu0 %2142, %v1266_v62   ;;  %1279 = vperm.xlu1 %2143, %v1249_v2  }
 0x584   : > { %2147 = vset.pattern.permute.xlu0 %v2261_v7  ;;  %2144 = vset.pattern.permute.xlu1 %v2265_v12 }
 0x585   : > { %1269 = vperm.xlu0 %2147, %v1247_v27   ;;  %1289 = vperm.xlu1 %2144, %v1263_v60  }
 0x589   : > { %1284 = vperm.xlu0 %2147, %v1250_v37   ;;  %2145 = vset.pattern.permute.xlu1 %v2261_v7 }
 0x58a   : > { %1274 = vperm.xlu1 %2145, %v1248_v36  }
 0x58e   : > { %2146 = vset.pattern.permute.xlu1 %v2265_v12 }
 0x58f   : > { %1294 = vperm.xlu1 %2146, %v1264_v18  }
 0x593   : > { %2148 = vset.pattern.permute.xlu1 %v2261_v7 }
 0x5de   : > { %v1334_v17 = vpop.permute.xlu0 %1333 }
 0x5df   : > { %v1344_v9 = vsub.f32 %v2906_v45, %v1334_v17 }
 0x5e1   : > { %1390 = vperm.xlu1 %2148, %v1344_v9  }
 0x5e2   : > { %v1332_v24 = vpop.permute.xlu0 %1331  ;;  %v1338_v63 = vpop.permute.xlu1 %1337 }
 0x5e3   : > { %v1343_v51 = vsub.f32 %v2890_v21, %v1332_v24  ;;  %v1346_v38 = vsub.f32 %v2914_v33, %v1338_v63 }
 0x5e5   : > { %1385 = vperm.xlu1 %2148, %v1343_v51  }
 0x5e6   : > { %v1368_v52 = vpop.permute.xlu0 %1367  ;;  %v1336_v61 = vpop.permute.xlu1 %1335 }
 0x5e7   : > { %v1379_v53 = vsub.f32 %v2890_v21, %v1368_v52  ;;  %v1345_v7 = vsub.f32 %v2898_v28, %v1336_v61  ;;  %v1460_v21 = vld [vmem:[%s3105_s6 + $0x8] sm:$0xff] }
 0x5e8   : > { %v2034_v41 = vpack.c.bf16 %v1462_v16, %v1460_v21 }
 0x5e9   : > { %1405 = vperm.xlu0 %2147, %v1379_v53   ;;  %1400 = vperm.xlu1 %2148, %v1346_v38  }
 0x5ea   : > { %v1370_v12 = vpop.permute.xlu0 %1369  ;;  %v1372_v54 = vpop.permute.xlu1 %1371  ;;  %2035 = vmatprep.subr.bf16.mxu1 %v2034_v41 }
 0x5eb   : > { %v1380_v31 = vsub.f32 %v2906_v45, %v1370_v12  ;;  %v1381_v44 = vsub.f32 %v2898_v28, %v1372_v54  ;;  %v1459_v45 = vld [vmem:[%s3105_s6] sm:$0xff]  ;;  %v1461_v28 = vld [vmem:[%s3105_s6 + $0x10] sm:$0xff] }
 0x5ec   : > { %v2036_v58 = vpack.c.bf16 %v1461_v28, %v1459_v45 }
 0x5ed   : > { %1410 = vperm.xlu0 %2147, %v1380_v31   ;;  %1395 = vperm.xlu1 %2148, %v1345_v7  }
 0x5ee   : > { %v1374_v56 = vpop.permute.xlu1 %1373  ;;  %2037 = vmatpush1.bf16.msra.mxu1 %v2036_v58 }
 0x5ef   : > { %v1382_v19 = vsub.f32 %v2914_v33, %v1374_v56  ;;  %v2280_v33 = vmov 0.0   ;;  %2042 = vmatprep.subr.bf16.mxu1 %v2038_v22 }
 0x5f0   : > { %1540 = vmatprep.mubr.f32.mxu1 %v2280_v33  ;;  %1649 = vmatprep.mubr.f32.mxu0 %v2280_v33 }
 0x5f1   : > { %1415 = vperm.xlu1 %2148, %v1381_v44  }
 0x5f5   : > { %1420 = vperm.xlu1 %2148, %v1382_v19  }
 0x5fb   : > { %v1300_v59 = vpop.permute.xlu0 %1299 }
 0x5ff   : > { %v1280_v36 = vpop.permute.xlu1 %1279  ;;  %v1305_v27 = vpop.permute.xlu0 %1304 }
 0x600   : > { %v1309_v11 = vsel %vm411_vm1, %v1280_v36, %v1300_v59  ;;  %v2173_v36 = vld [vmem:[%s2439_s17] sm:$0xff]  ;;  %v2174_v59 = vld [vmem:[%s2439_s17 + $0x8] sm:$0xff] }
 0x601   : > { %v1429_v34 = vmul.f32 %v1309_v11, %v2815_v57 }
 0x604   : > { %v1290_v29 = vpop.permute.xlu1 %1289  ;;  %v1270_v30 = vpop.permute.xlu0 %1269 }
 0x605   : > { %v1307_v40 = vsel %vm411_vm1, %v1270_v30, %v1290_v29 }
 0x606   : > { %v1427_v18 = vmul.f32 %v1307_v40, %v2743_v14  ;;  %v2176_v40 = vld [vmem:[%s2439_s17 + $0x18] sm:$0xff] }
 0x608   : > { %v1285_v2 = vpop.permute.xlu0 %1284 }
 0x609   : > { %v1275_v23 = vpop.permute.xlu1 %1274  ;;  %v1310_v42 = vsel %vm411_vm1, %v1285_v2, %v1305_v27  ;;  %v2175_v2 = vld [vmem:[%s2439_s17 + $0x10] sm:$0xff] }
 0x60a   : > { %v1430_v35 = vmul.f32 %v1310_v42, %v2839_v39 }
 0x60e   : > { %v1295_v37 = vpop.permute.xlu1 %1294 }
 0x60f   : > { %v1308_v3 = vsel %vm411_vm1, %v1275_v23, %v1295_v37 }
 0x610   : > { %v1428_v55 = vmul.f32 %v1308_v3, %v2780_v8 }
 0x660   : > { %v1391_v60 = vpop.permute.xlu1 %1390 }
 0x664   : > { %v1386_v47 = vpop.permute.xlu1 %1385 }
 0x668   : > { %v1406_v43 = vpop.permute.xlu0 %1405  ;;  %v1401_v62 = vpop.permute.xlu1 %1400 }
 0x669   : > { %v1423_v6 = vsel %vm411_vm1, %v1386_v47, %v1406_v43 }
 0x66a   : > { %v1431_v13 = vadd.f32 %v1427_v18, %v1423_v6 }
 0x66c   : > { %v1849_v5 = vmul.f32 -1.442695, %v1431_v13  ;;  %v1411_v0 = vpop.permute.xlu0 %1410  ;;  %v1396_v10 = vpop.permute.xlu1 %1395  ;;  %v2177_v13 = vld [vmem:[%s2439_s17 + $0x20] sm:$0xff] }
 0x66d   : > { %v1424_v14 = vsel %vm411_vm1, %v1391_v60, %v1411_v0 }
 0x66e   : > { %2157 = vpow2.f32 %v1849_v5  ;;  %v1432_v49 = vadd.f32 %v1428_v55, %v1424_v14  ;;  %v2178_v5 = vld [vmem:[%s2439_s17 + $0x28] sm:$0xff] }
 0x670   : > { %v1850_v25 = vmul.f32 -1.442695, %v1432_v49  ;;  %v1416_v26 = vpop.permute.xlu1 %1415 }
 0x671   : > { %v1425_v8 = vsel %vm411_vm1, %v1396_v10, %v1416_v26  ;;  %v2180_v26 = vld [vmem:[%s2439_s17 + $0x38] sm:$0xff] }
 0x672   : > { %2159 = vpow2.f32 %v1850_v25  ;;  %v1433_v46 = vadd.f32 %v1429_v34, %v1425_v8  ;;  %v2179_v34 = vld [vmem:[%s2439_s17 + $0x30] sm:$0xff] }
 0x674   : > { %v1851_v48 = vmul.f32 -1.442695, %v1433_v46  ;;  %v1421_v17 = vpop.permute.xlu1 %1420 }
 0x675   : > { %v1426_v9 = vsel %vm411_vm1, %v1401_v62, %v1421_v17 }
 0x676   : > { %2161 = vpow2.f32 %v1851_v48  ;;  %v1434_v24 = vadd.f32 %v1430_v35, %v1426_v9 }
 0x678   : > { %v2158_v57 = vpop.eup %2157  ;;  %v1852_v63 = vmul.f32 -1.442695, %v1434_v24 }
 0x679   : > { %v1447_v51 = vadd.f32 1.0, %v2158_v57 }
 0x67a   : > { %2163 = vpow2.f32 %v1852_v63 }
 0x67b   : > { %2165 = vrcp.f32 %v1447_v51 }
 0x67c   : > { %v2160_v52 = vpop.eup %2159 }
 0x67d   : > { %v1448_v61 = vadd.f32 1.0, %v2160_v52 }
 0x67f   : > { %2167 = vrcp.f32 %v1448_v61 }
 0x680   : > { %v2162_v38 = vpop.eup %2161 }
 0x681   : > { %v1449_v53 = vadd.f32 1.0, %v2162_v38 }
 0x683   : > { %2169 = vrcp.f32 %v1449_v53 }
 0x684   : > { %v2164_v39 = vpop.eup %2163 }
 0x685   : > { %v2166_v12 = vpop.eup %2165  ;;  %v1450_v54 = vadd.f32 1.0, %v2164_v39 }
 0x686   : > { %1569 = vrot.lane.b32.xlu1 %v2166_v12, %s2281_s24  ;;  %1853 = vmatmul.mubr.msk.f32.vlgmr.msra.gmra.mrb[8].mxu1 %vm1463_vm0, %v2166_v12 }
 0x687   : > { %2171 = vrcp.f32 %v1450_v54  ;;  %1546 = vmatprep.mubr.f32.mxu1 %v2280_v33  ;;  %2043 = vmatpush1.bf16.msra.mxu1 %v2040_v32 }
 0x689   : > { %v2168_v4 = vpop.eup %2167 }
 0x68a   : > { %1571 = vrot.lane.b32.xlu1 %v2168_v4, %s2281_s24  ;;  %1854 = vmatmul.mubr.msk.f32.gmra.mrb[10].mxu1 %vm1463_vm0, %v2168_v4 }
 0x68b   : > { %1552 = vmatprep.mubr.f32.mxu1 %v2280_v33 }
 0x68d   : > { %v2170_v7 = vpop.eup %2169 }
 0x68e   : > { %1573 = vrot.lane.b32.xlu0 %v2170_v7, %s2281_s24  ;;  %1855 = vmatmul.mubr.msk.f32.gmra.mrb[12].mxu1 %vm1463_vm0, %v2170_v7 }
 0x68f   : > { %1558 = vmatprep.mubr.f32.mxu1 %v2280_v33 }
 0x691   : > { %v2172_v31 = vpop.eup %2171 }
 0x692   : > { %1575 = vrot.lane.b32.xlu0 %v2172_v31, %s2281_s24  ;;  %1856 = vmatmul.mubr.msk.f32.gmra.mrb[14].mxu1 %vm1463_vm0, %v2172_v31  ;;  %s2185_s24 = sshll.u32 %s2282_s25, 4  ;;  %s2186_s24 = int_to_ptr.vmem [resolvable:$false] %s2185_s24 }
 0x693   : > { %1661 = vmatprep.mubr.f32.mxu1 %v2280_v33  ;;  %s2187_s15 = scalar_lea.vmem %s2186_s24, 2048  ;;  %p2188_p1 = scmp.lt.s32.totalorder %s3046_s28, %s2186_s24 }
 0x694   : > { %p2189_p2 = scmp.lt.s32.totalorder %s2187_s15, %s2181_s18 }
 0x696   : > { %p2190_p3 = por %p2189_p2, %p2188_p1 }
 0x698   : > { %p2191_p5 = pnand %p2190_p3, %p2184_p0 }
 0x6f8   : > { %v1570_v44 = vpop.permute.xlu1 %1569 }
 0x6f9   : > { %1857 = vmatmul.mubr.msk.f32.vlgmr.msra.gmra.mrb[8].mxu0 %vm1463_vm0, %v1570_v44 }
 0x6fa   : > { %1655 = vmatprep.mubr.f32.mxu0 %v2280_v33 }
 0x6fc   : > { %v1572_v56 = vpop.permute.xlu1 %1571 }
 0x6fd   : > { %1858 = vmatmul.mubr.msk.f32.gmra.mrb[10].mxu0 %vm1463_vm0, %v1572_v56 }
 0x700   : > { %v1574_v19 = vpop.permute.xlu0 %1573 }
 0x701   : > { %1859 = vmatmul.mubr.msk.f32.vlgmr.msra.gmra.mrb[16].mxu1 %vm1463_vm0, %v1574_v19 }
 0x702   : > { %1667 = vmatprep.mubr.f32.mxu1 %v2280_v33 }
 0x704   : > { %v1576_v21 = vpop.permute.xlu0 %1575 }
 0x705   : > { %1860 = vmatmul.mubr.msk.f32.gmra.mrb[18].mxu1 %vm1463_vm0, %v1576_v21 }
 0x759   : > { %v1542_v16 = vpop.f32.mrb[8].mxu1 }
 0x75a   : > { %v1544_v41 = vpop.f32.mrb[9].mxu1 }
 0x75d   : > { %v1548_v45 = vpop.f32.mrb[10].mxu1 }
 0x75e   : > { %v1550_v28 = vpop.f32.mrb[11].mxu1 }
 0x761   : > { %v1554_v58 = vpop.f32.mrb[12].mxu1 }
 0x762   : > { %v1556_v1 = vpop.f32.mrb[13].mxu1 }
 0x765   : > { %v1560_v20 = vpop.f32.mrb[14].mxu1 }
 0x766   : > { %v1562_v15 = vpop.f32.mrb[15].mxu1 }
 0x7cc   : > { %v1651_v22 = vpop.f32.mrb[8].mxu0 }
 0x7cd   : > { %v1674_v50 = vmul.f32 %v1651_v22, %v1542_v16  ;;  %v1653_v33 = vpop.f32.mrb[9].mxu0 }
 0x7ce   : > { %v1675_v32 = vmul.f32 %v1653_v33, %v1544_v41 }
 0x7cf   : > { %v1682_v29 = vmul.f32 %v2173_v36, %v1674_v50 }
 0x7d0   : > { %v1683_v23 = vmul.f32 %v2174_v59, %v1675_v32  ;;  %v1657_v27 = vpop.f32.mrb[10].mxu0 }
 0x7d1   : > { %1690 = vst [vmem:[%s3026_s23] sm:$0xff] %v1682_v29  ;;  %v1676_v37 = vmul.f32 %v1657_v27, %v1548_v45  ;;  %v1659_v30 = vpop.f32.mrb[11].mxu0 }
 0x7d2   : > { %1691 = vst [vmem:[%s3026_s23 + $0x8] sm:$0xff] %v1683_v23  ;;  %v1677_v60 = vmul.f32 %v1659_v30, %v1550_v28 }
 0x7d3   : > { %v1684_v47 = vmul.f32 %v2175_v2, %v1676_v37 }
 0x7d4   : > { %v1685_v18 = vmul.f32 %v2176_v40, %v1677_v60  ;;  %v1663_v43 = vpop.f32.mrb[16].mxu1 }
 0x7d5   : > { %1692 = vst [vmem:[%s3026_s23 + $0x10] sm:$0xff] %v1684_v47  ;;  %v1678_v62 = vmul.f32 %v1663_v43, %v1554_v58  ;;  %v1665_v3 = vpop.f32.mrb[17].mxu1 }
 0x7d6   : > { %1693 = vst [vmem:[%s3026_s23 + $0x18] sm:$0xff] %v1685_v18  ;;  %v1679_v6 = vmul.f32 %v1665_v3, %v1556_v1 }
 0x7d7   : > { %v1686_v55 = vmul.f32 %v2177_v13, %v1678_v62 }
 0x7d8   : > { %v1687_v0 = vmul.f32 %v2178_v5, %v1679_v6  ;;  %v1669_v10 = vpop.f32.mrb[18].mxu1 }
 0x7d9   : > { %1694 = vst [vmem:[%s3026_s23 + $0x20] sm:$0xff] %v1686_v55  ;;  %v1680_v11 = vmul.f32 %v1669_v10, %v1560_v20  ;;  %v1671_v14 = vpop.f32.mrb[19].mxu1 }
 0x7da   : > { %1695 = vst [vmem:[%s3026_s23 + $0x28] sm:$0xff] %v1687_v0  ;;  %v1681_v49 = vmul.f32 %v1671_v14, %v1562_v15 }
 0x7db   : > { %v1688_v25 = vmul.f32 %v2179_v34, %v1680_v11 }
 0x7dc   : > { %v1689_v42 = vmul.f32 %v2180_v26, %v1681_v49 }
 0x7dd   : > { %1696 = vst [vmem:[%s3026_s23 + $0x30] sm:$0xff] %v1688_v25 }
 0x7de   : > { %1697 = vst [vmem:[%s3026_s23 + $0x38] sm:$0xff] %v1689_v42 }
 0x7df   : > { %2194 = shalt.err (!%p2191_p5)
}
 0x7e0   : > { %s2195_s17 = scalar_lea.hbm %s3044_s26, 1024  ;;  %s2199_s27 = scalar_lea.hbm %s3108_s9, 2048 }
 0x7e1   : > { %p2196_p6 = scmp.ne.s32.totalorder %s3044_s26, %s2195_s17  ;;  %p2200_p10 = scmp.lt.u32.totalorder %s3044_s26, %s3108_s9 }
 0x7e2   : > { %p2201_p11 = scmp.lt.u32.totalorder %s2199_s27, %s2195_s17  ;;  %p2203_p13 = scmp.lt.u32.totalorder %s2195_s17, %s3044_s26 }
 0x7e3   : > { %p2197_p7 = pnand %p2196_p6, %p2375_p4 }
 0x7e4   : > { %p2202_p12 = por %p2201_p11, %p2200_p10 }
 0x7e5   : > { %p2198_p9 = pneg %p2197_p7 }
 0x7e6   : > { %p2204_p0 = por %p2203_p13, %p2202_p12 }
 0x7e8   : > { %p2205_p1 = pnand %p2204_p0, %p2198_p9 }
 0x7ea   : > { %2208 = shalt.err (!%p2205_p1)
}
 0x7eb   : > { %s2283_s18 = smov 256   ;;  %s2284_s25 = smov 16  }
 0x7ec   : > { %2048 = dma.vmem_to_hbm [thread:$0]  (%p2375_p4), %s3046_s28, 1024, %s3044_s26, %s3053_s12, %s2283_s18, %s2283_s18, %s2284_s25  }
 0x7ed PF: > { %p2054_p2 = scmp.ge.s32.totalorder %s2259_s14, 2  ;;  %s1730_s24 = sand.u32 1, %s2239_s30  }
 0x7ee   : > { %s1731_s15 = scalar_lea.sflag [#allocation3], %s1730_s24 }
 0x7ef   : > { %p2051_p3 = pnand %p2054_p2, %p2382_p8 }
 0x7f1   : > { %2234 = dma.done.wait (!%p2051_p3), %s1731_s15, 1024  }
 0x7f2   : > { %2236 = vsyncadd (!%p2051_p3), %s1731_s15, 4294966272  ;;  %s22_s14 = sadd.s32 1, %s2259_s14   ;;  %s3128_s19 = sld [smem:[#allocation5_spill]] }
 0x7f3   : > { %p19_p5 = scmp.ge.s32.totalorder %s22_s14, 4   ;;  %s3129_s30 = smov %s2243_s10 }
 0x7f4   : > { %s3130_s10 = smov %s2247_s11  ;;  %s3131_s11 = smov %s2388_s22 }
 0x7f5   : > { %s3132_s12 = smov %s2255_s13  ;;  %21 = sbr.rel (!%p19_p5) target bundleno = 4 (0x4), region = 97 }
 0x7f8   : > { %s3133_s13 = smov %s3128_s19 }
 0x7fc   :  { %1736 = vsyncpa [#allocation3], 1 }
 0x7fd   :  { %1738 = vsyncpa [#allocation3 + $0x1], 1 }

</bundles_post_ra>
